<compile_context>
chip_gen: v7x
topology: tpu7x:2x2x1
jax: 0.10.0
libtpu: 0.0.40
codegen_flags: <defaults>
</compile_context>

<pallas_src>
import functools

import jax
import jax.numpy as jnp
from jax.experimental import pallas as pl
from jax.experimental.pallas import tpu as pltpu


# ---------------------------------------------------------------------------
# Fused kernel: LayerNorm(y), gated value, scaled-dot attention + softmax,
# weighted sum, in-VMEM zero pad, 3x3 conv (9 shifted matmuls), bias, residual.
# ---------------------------------------------------------------------------
def _fused_kernel(x_ref, y_ref, g_ref, bln_ref, wg_ref, bg_ref, wc_ref, bc_ref,
                  o_ref, pad_ref, *, h, w, scale):
    b, hw, c = x_ref.shape
    seq = y_ref.shape[1]

    # ---- LayerNorm over last dim (eps = 1e-5, elementwise affine), f32 ----
    y = y_ref[...]                                            # (b, seq, c)
    mean = jnp.mean(y, axis=-1, keepdims=True)
    var = jnp.mean((y - mean) ** 2, axis=-1, keepdims=True)
    key = (y - mean) * jax.lax.rsqrt(var + 1e-5) * g_ref[...] + bln_ref[...]

    # ---- gated "value": one fused (c, 2c) matmul over all b*seq rows ----
    y2 = y.reshape(b * seq, c)
    gates = jnp.dot(y2.astype(jnp.bfloat16), wg_ref[...],
                    preferred_element_type=jnp.float32) + bg_ref[...]
    concat = (jnp.tanh(gates[:, :c]) *
              jax.nn.sigmoid(gates[:, c:])).reshape(b, seq, c)

    # ---- scaled dot-product attention (batched, bf16 MXU operands) ----
    q = x_ref[...]                                            # (b, hw, c)
    s = jnp.einsum("bqc,bkc->bqk", q.astype(jnp.bfloat16),
                   key.astype(jnp.bfloat16),
                   preferred_element_type=jnp.float32) * scale
    s = s - jnp.max(s, axis=-1, keepdims=True)
    e = jnp.exp(s)
    p = e * pl.reciprocal(jnp.sum(e, axis=-1, keepdims=True), approx=True)
    end = jnp.einsum("bqk,bkc->bqc", p.astype(jnp.bfloat16),
                     concat.astype(jnp.bfloat16),
                     preferred_element_type=jnp.float32)      # (b, hw, c)

    # ---- zero-pad into VMEM scratch (no HBM round trip, no XLA pad op) ----
    pad_ref[...] = jnp.zeros_like(pad_ref)
    pad_ref[:, 1:h + 1, 1:w + 1, :] = end.reshape(b, h, w, c)

    # ---- 3x3 conv: 9 shifted (b*hw, c) @ (c, c) bf16 matmuls, f32 accum ----
    xp = pad_ref[...]                                         # (b, h+2, w+2, c)
    acc = jnp.zeros((b * hw, c), jnp.float32)
    for di in range(3):
        for dj in range(3):
            patch = xp[:, di:di + h, dj:dj + w, :].reshape(b * hw, c)
            acc = acc + jnp.dot(patch.astype(jnp.bfloat16), wc_ref[di, dj],
                                preferred_element_type=jnp.float32)

    # bias (broadcast once) + residual x
    out = acc + bc_ref[...] + q.reshape(b * hw, c)
    o_ref[...] = out.astype(o_ref.dtype)


# ---------------------------------------------------------------------------
# Wrapper
# ---------------------------------------------------------------------------
def multi_attn_fusion(x_nchw, y, params):
    """x_nchw: (b, c, h, w) float32; y: (b, seq, c) float32."""
    b, c, h, w = x_nchw.shape
    hw = h * w
    scale = float(c) ** (-0.5)

    # channels-last query / residual layout (single XLA transpose in)
    x_flat = jnp.transpose(x_nchw, (0, 2, 3, 1)).reshape(b, hw, c)

    gamma = params["ln_gamma"].reshape(1, c).astype(jnp.float32)
    beta = params["ln_beta"].reshape(1, c).astype(jnp.float32)
    # merged tanh|sigmoid gate weights: one (c, 2c) matmul in-kernel
    w_gate = jnp.concatenate([params["tanh_w"], params["sig_w"]],
                             axis=1).astype(jnp.bfloat16)             # (c, 2c)
    b_gate = jnp.concatenate([params["tanh_b"], params["sig_b"]]
                             ).reshape(1, 2 * c).astype(jnp.float32)  # (1, 2c)
    w_conv = params["conv_w"].astype(jnp.bfloat16)                    # (3,3,c,c) HWIO
    b_conv = params["conv_b"].reshape(1, c).astype(jnp.float32)

    out2d = pl.pallas_call(
        functools.partial(_fused_kernel, h=h, w=w, scale=scale),
        out_shape=jax.ShapeDtypeStruct((b * hw, c), jnp.float32),
        scratch_shapes=[pltpu.VMEM((b, h + 2, w + 2, c), jnp.float32)],
    )(x_flat, y, gamma, beta, w_gate, b_gate, w_conv, b_conv)

    # back to PyTorch NCHW (single XLA transpose out)
    return jnp.transpose(out2d.reshape(b, h, w, c), (0, 3, 1, 2))


# ---------------------------------------------------------------------------
# Pure-JAX f32 reference (sanity check only)
# ---------------------------------------------------------------------------
def reference(x_nchw, y, params):
    b, c, h, w = x_nchw.shape
    scale = float(c) ** (-0.5)
    q = jnp.transpose(x_nchw.reshape(b, c, h * w), (0, 2, 1))
    mean = jnp.mean(y, axis=-1, keepdims=True)
    var = jnp.mean((y - mean) ** 2, axis=-1, keepdims=True)
    key = (y - mean) / jnp.sqrt(var + 1e-5) * params["ln_gamma"] + params["ln_beta"]
    tg = jnp.tanh(y @ params["tanh_w"] + params["tanh_b"])
    sg = jax.nn.sigmoid(y @ params["sig_w"] + params["sig_b"])
    concated = tg * sg
    attn = jax.nn.softmax(jnp.einsum("bqc,bkc->bqk", q, key) * scale, axis=-1)
    end = jnp.einsum("bqk,bkc->bqc", attn, concated)
    end_nhwc = end.reshape(b, h, w, c)
    conv = jax.lax.conv_general_dilated(
        end_nhwc, params["conv_w"], window_strides=(1, 1), padding="SAME",
        dimension_numbers=("NHWC", "HWIO", "NHWC")) + params["conv_b"]
    out_nhwc = conv + jnp.transpose(x_nchw, (0, 2, 3, 1))
    return jnp.transpose(out_nhwc, (0, 3, 1, 2))


if __name__ == "__main__":
    # small shapes: batch=2, emb_dim=c=32, h=w=8 (hw=64), seq=8
    b, c, h, w, seq = 2, 32, 8, 8, 8
    key0 = jax.random.PRNGKey(0)
    ks = jax.random.split(key0, 10)

    x = jax.random.normal(ks[0], (b, c, h, w), jnp.float32)
    y = jax.random.normal(ks[1], (b, seq, c), jnp.float32)

    # deterministic synthetic parameters (shapes per nn.Module __init__)
    params = {
        "ln_gamma": jnp.ones((c,), jnp.float32),
        "ln_beta": jnp.zeros((c,), jnp.float32),
        "tanh_w": jax.random.normal(ks[2], (c, c), jnp.float32) * 0.1,   # (in, out)
        "tanh_b": jax.random.normal(ks[3], (c,), jnp.float32) * 0.1,
        "sig_w": jax.random.normal(ks[4], (c, c), jnp.float32) * 0.1,    # (in, out)
        "sig_b": jax.random.normal(ks[5], (c,), jnp.float32) * 0.1,
        "conv_w": jax.random.normal(ks[6], (3, 3, c, c), jnp.float32) * 0.05,  # HWIO
        "conv_b": jax.random.normal(ks[7], (c,), jnp.float32) * 0.05,
    }

    out = multi_attn_fusion(x, y, params)
    out = jax.block_until_ready(out)

    ref = reference(x, y, params)
    assert out.shape == (b, c, h, w)
    # bf16 MXU operands (per perf review) -> tolerance widened vs. pure-f32 ref.
    assert jnp.max(jnp.abs(out - ref)) < 5e-2, "mismatch vs reference"

    print("KERNEL_OK")
</pallas_src>

<mosaic_0001>
module attributes {stable_mosaic.version = 11 : i64} {
  func.func @_fused_kernel(%arg0: memref<2x64x32xf32, #tpu.memory_space<vmem>>, %arg1: memref<2x8x32xf32, #tpu.memory_space<vmem>>, %arg2: memref<1x32xf32, #tpu.memory_space<vmem>>, %arg3: memref<1x32xf32, #tpu.memory_space<vmem>>, %arg4: memref<32x64xbf16, #tpu.memory_space<vmem>>, %arg5: memref<1x64xf32, #tpu.memory_space<vmem>>, %arg6: memref<3x3x32x32xbf16, #tpu.memory_space<vmem>>, %arg7: memref<1x32xf32, #tpu.memory_space<vmem>>, %arg8: memref<128x32xf32, #tpu.memory_space<vmem>>, %arg9: memref<2x10x10x32xf32, #tpu.memory_space<vmem>>) attributes {dimension_semantics = [], scalar_prefetch = 0 : i64, scratch_operands = 1 : i64, tpu.core_type = #tpu.core_type<tc>} {
    %c0 = arith.constant 0 : index
    %c0_0 = arith.constant 0 : index
    %c0_1 = arith.constant 0 : index
    %0 = vector.load %arg1[%c0, %c0_0, %c0_1] : memref<2x8x32xf32, #tpu.memory_space<vmem>>, vector<2x8x32xf32>
    %cst = arith.constant dense<0.000000e+00> : vector<2x8xf32>
    %1 = vector.multi_reduction <add>, %0, %cst [2] : vector<2x8x32xf32> to vector<2x8xf32>
    %2 = vector.shape_cast %1 : vector<2x8xf32> to vector<2x8x1xf32>
    %cst_2 = arith.constant 3.200000e+01 : f32
    %3 = vector.broadcast %cst_2 : f32 to vector<2x8x1xf32>
    %4 = arith.divf %2, %3 : vector<2x8x1xf32>
    %5 = vector.broadcast %4 : vector<2x8x1xf32> to vector<2x8x32xf32>
    %6 = arith.subf %0, %5 : vector<2x8x32xf32>
    %7 = arith.mulf %6, %6 : vector<2x8x32xf32>
    %cst_3 = arith.constant dense<0.000000e+00> : vector<2x8xf32>
    %8 = vector.multi_reduction <add>, %7, %cst_3 [2] : vector<2x8x32xf32> to vector<2x8xf32>
    %9 = vector.shape_cast %8 : vector<2x8xf32> to vector<2x8x1xf32>
    %cst_4 = arith.constant 3.200000e+01 : f32
    %10 = vector.broadcast %cst_4 : f32 to vector<2x8x1xf32>
    %11 = arith.divf %9, %10 : vector<2x8x1xf32>
    %12 = vector.broadcast %4 : vector<2x8x1xf32> to vector<2x8x32xf32>
    %13 = arith.subf %0, %12 : vector<2x8x32xf32>
    %cst_5 = arith.constant 9.99999974E-6 : f32
    %14 = vector.broadcast %cst_5 : f32 to vector<2x8x1xf32>
    %15 = arith.addf %11, %14 : vector<2x8x1xf32>
    %16 = math.rsqrt %15 : vector<2x8x1xf32>
    %17 = vector.broadcast %16 : vector<2x8x1xf32> to vector<2x8x32xf32>
    %18 = arith.mulf %13, %17 : vector<2x8x32xf32>
    %c0_6 = arith.constant 0 : index
    %c0_7 = arith.constant 0 : index
    %19 = vector.load %arg2[%c0_6, %c0_7] : memref<1x32xf32, #tpu.memory_space<vmem>>, vector<1x32xf32>
    %20 = vector.shape_cast %19 : vector<1x32xf32> to vector<1x1x32xf32>
    %21 = vector.broadcast %20 : vector<1x1x32xf32> to vector<2x8x32xf32>
    %22 = arith.mulf %18, %21 : vector<2x8x32xf32>
    %c0_8 = arith.constant 0 : index
    %c0_9 = arith.constant 0 : index
    %23 = vector.load %arg3[%c0_8, %c0_9] : memref<1x32xf32, #tpu.memory_space<vmem>>, vector<1x32xf32>
    %24 = vector.shape_cast %23 : vector<1x32xf32> to vector<1x1x32xf32>
    %25 = vector.broadcast %24 : vector<1x1x32xf32> to vector<2x8x32xf32>
    %26 = arith.addf %22, %25 : vector<2x8x32xf32>
    %27 = vector.shape_cast %0 : vector<2x8x32xf32> to vector<16x32xf32>
    %28 = arith.truncf %27 : vector<16x32xf32> to vector<16x32xbf16>
    %c0_10 = arith.constant 0 : index
    %c0_11 = arith.constant 0 : index
    %29 = vector.load %arg4[%c0_10, %c0_11] : memref<32x64xbf16, #tpu.memory_space<vmem>>, vector<32x64xbf16>
    %cst_12 = arith.constant dense<0.000000e+00> : vector<16x64xf32>
    %30 = tpu.matmul %28, %29, %cst_12 {dimension_numbers = #tpu.dot_dimension_numbers<[1], [0], [0], [1], [0, 0, 1, 1], [], []>} : vector<16x32xbf16>, vector<32x64xbf16>, vector<16x64xf32> -> vector<16x64xf32>
    %c0_13 = arith.constant 0 : index
    %c0_14 = arith.constant 0 : index
    %31 = vector.load %arg5[%c0_13, %c0_14] : memref<1x64xf32, #tpu.memory_space<vmem>>, vector<1x64xf32>
    %32 = vector.broadcast %31 : vector<1x64xf32> to vector<16x64xf32>
    %33 = arith.addf %30, %32 : vector<16x64xf32>
    %34 = vector.extract_strided_slice %33 {offsets = [0, 0], sizes = [16, 32], strides = [1, 1]} : vector<16x64xf32> to vector<16x32xf32>
    %35 = math.tanh %34 : vector<16x32xf32>
    %36 = vector.extract_strided_slice %33 {offsets = [0, 32], sizes = [16, 32], strides = [1, 1]} : vector<16x64xf32> to vector<16x32xf32>
    %37 = arith.negf %36 : vector<16x32xf32>
    %38 = math.exp %37 : vector<16x32xf32>
    %cst_15 = arith.constant 1.000000e+00 : f32
    %39 = vector.broadcast %cst_15 : f32 to vector<16x32xf32>
    %40 = arith.addf %39, %38 : vector<16x32xf32>
    %41 = arith.divf %39, %40 : vector<16x32xf32>
    %42 = arith.mulf %35, %41 : vector<16x32xf32>
    %43 = vector.shape_cast %42 : vector<16x32xf32> to vector<2x8x32xf32>
    %c0_16 = arith.constant 0 : index
    %c0_17 = arith.constant 0 : index
    %c0_18 = arith.constant 0 : index
    %44 = vector.load %arg0[%c0_16, %c0_17, %c0_18] : memref<2x64x32xf32, #tpu.memory_space<vmem>>, vector<2x64x32xf32>
    %45 = arith.truncf %44 : vector<2x64x32xf32> to vector<2x64x32xbf16>
    %46 = arith.truncf %26 : vector<2x8x32xf32> to vector<2x8x32xbf16>
    "tpu.trace_start"() <{level = 10 : i32, message = "bqc,bkc->bqk"}> : () -> ()
    %cst_19 = arith.constant dense<0.000000e+00> : vector<2x64x8xf32>
    %47 = tpu.matmul %45, %46, %cst_19 {dimension_numbers = #tpu.dot_dimension_numbers<[2], [2], [1], [1], [0, 0, 0, 1, 1, 1], [0], [0]>} : vector<2x64x32xbf16>, vector<2x8x32xbf16>, vector<2x64x8xf32> -> vector<2x64x8xf32>
    "tpu.trace_stop"() : () -> ()
    %cst_20 = arith.constant 0.176776692 : f32
    %48 = vector.broadcast %cst_20 : f32 to vector<2x64x8xf32>
    %49 = arith.mulf %47, %48 : vector<2x64x8xf32>
    %cst_21 = arith.constant dense<0xFF800000> : vector<2x64xf32>
    %50 = vector.multi_reduction <maximumf>, %49, %cst_21 [2] : vector<2x64x8xf32> to vector<2x64xf32>
    %51 = vector.shape_cast %50 : vector<2x64xf32> to vector<2x64x1xf32>
    %52 = vector.broadcast %51 : vector<2x64x1xf32> to vector<2x64x8xf32>
    %53 = arith.subf %49, %52 : vector<2x64x8xf32>
    %54 = math.exp %53 : vector<2x64x8xf32>
    %cst_22 = arith.constant dense<0.000000e+00> : vector<2x64xf32>
    %55 = vector.multi_reduction <add>, %54, %cst_22 [2] : vector<2x64x8xf32> to vector<2x64xf32>
    %56 = vector.shape_cast %55 : vector<2x64xf32> to vector<2x64x1xf32>
    %57 = tpu.reciprocal %56 {approx = true} : vector<2x64x1xf32> -> vector<2x64x1xf32>
    %58 = vector.broadcast %57 : vector<2x64x1xf32> to vector<2x64x8xf32>
    %59 = arith.mulf %54, %58 : vector<2x64x8xf32>
    %60 = arith.truncf %59 : vector<2x64x8xf32> to vector<2x64x8xbf16>
    %61 = arith.truncf %43 : vector<2x8x32xf32> to vector<2x8x32xbf16>
    "tpu.trace_start"() <{level = 10 : i32, message = "bqk,bkc->bqc"}> : () -> ()
    %cst_23 = arith.constant dense<0.000000e+00> : vector<2x64x32xf32>
    %62 = tpu.matmul %60, %61, %cst_23 {dimension_numbers = #tpu.dot_dimension_numbers<[2], [1], [1], [2], [0, 0, 0, 1, 1, 2], [0], [0]>} : vector<2x64x8xbf16>, vector<2x8x32xbf16>, vector<2x64x32xf32> -> vector<2x64x32xf32>
    %cst_24 = arith.constant 0.000000e+00 : f32
    "tpu.trace_stop"() : () -> ()
    %63 = vector.broadcast %cst_24 : f32 to vector<2x10x10x32xf32>
    %c0_25 = arith.constant 0 : index
    %c0_26 = arith.constant 0 : index
    %c0_27 = arith.constant 0 : index
    %c0_28 = arith.constant 0 : index
    %64 = vector.load %arg9[%c0_25, %c0_26, %c0_27, %c0_28] : memref<2x10x10x32xf32, #tpu.memory_space<vmem>>, vector<2x10x10x32xf32>
    tpu.vector_store %arg9[%c0_25, %c0_26, %c0_27, %c0_28], %63 {strides = array<i32>} : memref<2x10x10x32xf32, #tpu.memory_space<vmem>>, vector<2x10x10x32xf32>,
    %65 = vector.shape_cast %62 : vector<2x64x32xf32> to vector<2x8x8x32xf32>
    %c0_29 = arith.constant 0 : index
    %c1 = arith.constant 1 : index
    %c1_30 = arith.constant 1 : index
    %c0_31 = arith.constant 0 : index
    %66 = vector.load %arg9[%c0_29, %c1, %c1_30, %c0_31] : memref<2x10x10x32xf32, #tpu.memory_space<vmem>>, vector<2x8x8x32xf32>
    tpu.vector_store %arg9[%c0_29, %c1, %c1_30, %c0_31], %65 {strides = array<i32>} : memref<2x10x10x32xf32, #tpu.memory_space<vmem>>, vector<2x8x8x32xf32>,
    %c0_32 = arith.constant 0 : index
    %c0_33 = arith.constant 0 : index
    %c0_34 = arith.constant 0 : index
    %c0_35 = arith.constant 0 : index
    %67 = vector.load %arg9[%c0_32, %c0_33, %c0_34, %c0_35] : memref<2x10x10x32xf32, #tpu.memory_space<vmem>>, vector<2x10x10x32xf32>
    %cst_36 = arith.constant 0.000000e+00 : f32
    %68 = vector.broadcast %cst_36 : f32 to vector<128x32xf32>
    %69 = vector.extract_strided_slice %67 {offsets = [0, 0, 0, 0], sizes = [2, 8, 8, 32], strides = [1, 1, 1, 1]} : vector<2x10x10x32xf32> to vector<2x8x8x32xf32>
    %70 = vector.shape_cast %69 : vector<2x8x8x32xf32> to vector<128x32xf32>
    %71 = arith.truncf %70 : vector<128x32xf32> to vector<128x32xbf16>
    %c0_37 = arith.constant 0 : index
    %c0_38 = arith.constant 0 : index
    %c0_39 = arith.constant 0 : index
    %c0_40 = arith.constant 0 : index
    %72 = vector.load %arg6[%c0_37, %c0_38, %c0_39, %c0_40] : memref<3x3x32x32xbf16, #tpu.memory_space<vmem>>, vector<1x1x32x32xbf16>
    %73 = vector.shape_cast %72 : vector<1x1x32x32xbf16> to vector<32x32xbf16>
    %cst_41 = arith.constant dense<0.000000e+00> : vector<128x32xf32>
    %74 = tpu.matmul %71, %73, %cst_41 {dimension_numbers = #tpu.dot_dimension_numbers<[1], [0], [0], [1], [0, 0, 1, 1], [], []>} : vector<128x32xbf16>, vector<32x32xbf16>, vector<128x32xf32> -> vector<128x32xf32>
    %75 = arith.addf %68, %74 : vector<128x32xf32>
    %76 = vector.extract_strided_slice %67 {offsets = [0, 0, 1, 0], sizes = [2, 8, 8, 32], strides = [1, 1, 1, 1]} : vector<2x10x10x32xf32> to vector<2x8x8x32xf32>
    %77 = vector.shape_cast %76 : vector<2x8x8x32xf32> to vector<128x32xf32>
    %78 = arith.truncf %77 : vector<128x32xf32> to vector<128x32xbf16>
    %c0_42 = arith.constant 0 : index
    %c1_43 = arith.constant 1 : index
    %c0_44 = arith.constant 0 : index
    %c0_45 = arith.constant 0 : index
    %79 = vector.load %arg6[%c0_42, %c1_43, %c0_44, %c0_45] : memref<3x3x32x32xbf16, #tpu.memory_space<vmem>>, vector<1x1x32x32xbf16>
    %80 = vector.shape_cast %79 : vector<1x1x32x32xbf16> to vector<32x32xbf16>
    %cst_46 = arith.constant dense<0.000000e+00> : vector<128x32xf32>
    %81 = tpu.matmul %78, %80, %cst_46 {dimension_numbers = #tpu.dot_dimension_numbers<[1], [0], [0], [1], [0, 0, 1, 1], [], []>} : vector<128x32xbf16>, vector<32x32xbf16>, vector<128x32xf32> -> vector<128x32xf32>
    %82 = arith.addf %75, %81 : vector<128x32xf32>
    %83 = vector.extract_strided_slice %67 {offsets = [0, 0, 2, 0], sizes = [2, 8, 8, 32], strides = [1, 1, 1, 1]} : vector<2x10x10x32xf32> to vector<2x8x8x32xf32>
    %84 = vector.shape_cast %83 : vector<2x8x8x32xf32> to vector<128x32xf32>
    %85 = arith.truncf %84 : vector<128x32xf32> to vector<128x32xbf16>
    %c0_47 = arith.constant 0 : index
    %c2 = arith.constant 2 : index
    %c0_48 = arith.constant 0 : index
    %c0_49 = arith.constant 0 : index
    %86 = vector.load %arg6[%c0_47, %c2, %c0_48, %c0_49] : memref<3x3x32x32xbf16, #tpu.memory_space<vmem>>, vector<1x1x32x32xbf16>
    %87 = vector.shape_cast %86 : vector<1x1x32x32xbf16> to vector<32x32xbf16>
    %cst_50 = arith.constant dense<0.000000e+00> : vector<128x32xf32>
    %88 = tpu.matmul %85, %87, %cst_50 {dimension_numbers = #tpu.dot_dimension_numbers<[1], [0], [0], [1], [0, 0, 1, 1], [], []>} : vector<128x32xbf16>, vector<32x32xbf16>, vector<128x32xf32> -> vector<128x32xf32>
    %89 = arith.addf %82, %88 : vector<128x32xf32>
    %90 = vector.extract_strided_slice %67 {offsets = [0, 1, 0, 0], sizes = [2, 8, 8, 32], strides = [1, 1, 1, 1]} : vector<2x10x10x32xf32> to vector<2x8x8x32xf32>
    %91 = vector.shape_cast %90 : vector<2x8x8x32xf32> to vector<128x32xf32>
    %92 = arith.truncf %91 : vector<128x32xf32> to vector<128x32xbf16>
    %c1_51 = arith.constant 1 : index
    %c0_52 = arith.constant 0 : index
    %c0_53 = arith.constant 0 : index
    %c0_54 = arith.constant 0 : index
    %93 = vector.load %arg6[%c1_51, %c0_52, %c0_53, %c0_54] : memref<3x3x32x32xbf16, #tpu.memory_space<vmem>>, vector<1x1x32x32xbf16>
    %94 = vector.shape_cast %93 : vector<1x1x32x32xbf16> to vector<32x32xbf16>
    %cst_55 = arith.constant dense<0.000000e+00> : vector<128x32xf32>
    %95 = tpu.matmul %92, %94, %cst_55 {dimension_numbers = #tpu.dot_dimension_numbers<[1], [0], [0], [1], [0, 0, 1, 1], [], []>} : vector<128x32xbf16>, vector<32x32xbf16>, vector<128x32xf32> -> vector<128x32xf32>
    %96 = arith.addf %89, %95 : vector<128x32xf32>
    %97 = vector.extract_strided_slice %67 {offsets = [0, 1, 1, 0], sizes = [2, 8, 8, 32], strides = [1, 1, 1, 1]} : vector<2x10x10x32xf32> to vector<2x8x8x32xf32>
    %98 = vector.shape_cast %97 : vector<2x8x8x32xf32> to vector<128x32xf32>
    %99 = arith.truncf %98 : vector<128x32xf32> to vector<128x32xbf16>
    %c1_56 = arith.constant 1 : index
    %c1_57 = arith.constant 1 : index
    %c0_58 = arith.constant 0 : index
    %c0_59 = arith.constant 0 : index
    %100 = vector.load %arg6[%c1_56, %c1_57, %c0_58, %c0_59] : memref<3x3x32x32xbf16, #tpu.memory_space<vmem>>, vector<1x1x32x32xbf16>
    %101 = vector.shape_cast %100 : vector<1x1x32x32xbf16> to vector<32x32xbf16>
    %cst_60 = arith.constant dense<0.000000e+00> : vector<128x32xf32>
    %102 = tpu.matmul %99, %101, %cst_60 {dimension_numbers = #tpu.dot_dimension_numbers<[1], [0], [0], [1], [0, 0, 1, 1], [], []>} : vector<128x32xbf16>, vector<32x32xbf16>, vector<128x32xf32> -> vector<128x32xf32>
    %103 = arith.addf %96, %102 : vector<128x32xf32>
    %104 = vector.extract_strided_slice %67 {offsets = [0, 1, 2, 0], sizes = [2, 8, 8, 32], strides = [1, 1, 1, 1]} : vector<2x10x10x32xf32> to vector<2x8x8x32xf32>
    %105 = vector.shape_cast %104 : vector<2x8x8x32xf32> to vector<128x32xf32>
    %106 = arith.truncf %105 : vector<128x32xf32> to vector<128x32xbf16>
    %c1_61 = arith.constant 1 : index
    %c2_62 = arith.constant 2 : index
    %c0_63 = arith.constant 0 : index
    %c0_64 = arith.constant 0 : index
    %107 = vector.load %arg6[%c1_61, %c2_62, %c0_63, %c0_64] : memref<3x3x32x32xbf16, #tpu.memory_space<vmem>>, vector<1x1x32x32xbf16>
    %108 = vector.shape_cast %107 : vector<1x1x32x32xbf16> to vector<32x32xbf16>
    %cst_65 = arith.constant dense<0.000000e+00> : vector<128x32xf32>
    %109 = tpu.matmul %106, %108, %cst_65 {dimension_numbers = #tpu.dot_dimension_numbers<[1], [0], [0], [1], [0, 0, 1, 1], [], []>} : vector<128x32xbf16>, vector<32x32xbf16>, vector<128x32xf32> -> vector<128x32xf32>
    %110 = arith.addf %103, %109 : vector<128x32xf32>
    %111 = vector.extract_strided_slice %67 {offsets = [0, 2, 0, 0], sizes = [2, 8, 8, 32], strides = [1, 1, 1, 1]} : vector<2x10x10x32xf32> to vector<2x8x8x32xf32>
    %112 = vector.shape_cast %111 : vector<2x8x8x32xf32> to vector<128x32xf32>
    %113 = arith.truncf %112 : vector<128x32xf32> to vector<128x32xbf16>
    %c2_66 = arith.constant 2 : index
    %c0_67 = arith.constant 0 : index
    %c0_68 = arith.constant 0 : index
    %c0_69 = arith.constant 0 : index
    %114 = vector.load %arg6[%c2_66, %c0_67, %c0_68, %c0_69] : memref<3x3x32x32xbf16, #tpu.memory_space<vmem>>, vector<1x1x32x32xbf16>
    %115 = vector.shape_cast %114 : vector<1x1x32x32xbf16> to vector<32x32xbf16>
    %cst_70 = arith.constant dense<0.000000e+00> : vector<128x32xf32>
    %116 = tpu.matmul %113, %115, %cst_70 {dimension_numbers = #tpu.dot_dimension_numbers<[1], [0], [0], [1], [0, 0, 1, 1], [], []>} : vector<128x32xbf16>, vector<32x32xbf16>, vector<128x32xf32> -> vector<128x32xf32>
    %117 = arith.addf %110, %116 : vector<128x32xf32>
    %118 = vector.extract_strided_slice %67 {offsets = [0, 2, 1, 0], sizes = [2, 8, 8, 32], strides = [1, 1, 1, 1]} : vector<2x10x10x32xf32> to vector<2x8x8x32xf32>
    %119 = vector.shape_cast %118 : vector<2x8x8x32xf32> to vector<128x32xf32>
    %120 = arith.truncf %119 : vector<128x32xf32> to vector<128x32xbf16>
    %c2_71 = arith.constant 2 : index
    %c1_72 = arith.constant 1 : index
    %c0_73 = arith.constant 0 : index
    %c0_74 = arith.constant 0 : index
    %121 = vector.load %arg6[%c2_71, %c1_72, %c0_73, %c0_74] : memref<3x3x32x32xbf16, #tpu.memory_space<vmem>>, vector<1x1x32x32xbf16>
    %122 = vector.shape_cast %121 : vector<1x1x32x32xbf16> to vector<32x32xbf16>
    %cst_75 = arith.constant dense<0.000000e+00> : vector<128x32xf32>
    %123 = tpu.matmul %120, %122, %cst_75 {dimension_numbers = #tpu.dot_dimension_numbers<[1], [0], [0], [1], [0, 0, 1, 1], [], []>} : vector<128x32xbf16>, vector<32x32xbf16>, vector<128x32xf32> -> vector<128x32xf32>
    %124 = arith.addf %117, %123 : vector<128x32xf32>
    %125 = vector.extract_strided_slice %67 {offsets = [0, 2, 2, 0], sizes = [2, 8, 8, 32], strides = [1, 1, 1, 1]} : vector<2x10x10x32xf32> to vector<2x8x8x32xf32>
    %126 = vector.shape_cast %125 : vector<2x8x8x32xf32> to vector<128x32xf32>
    %127 = arith.truncf %126 : vector<128x32xf32> to vector<128x32xbf16>
    %c2_76 = arith.constant 2 : index
    %c2_77 = arith.constant 2 : index
    %c0_78 = arith.constant 0 : index
    %c0_79 = arith.constant 0 : index
    %128 = vector.load %arg6[%c2_76, %c2_77, %c0_78, %c0_79] : memref<3x3x32x32xbf16, #tpu.memory_space<vmem>>, vector<1x1x32x32xbf16>
    %129 = vector.shape_cast %128 : vector<1x1x32x32xbf16> to vector<32x32xbf16>
    %cst_80 = arith.constant dense<0.000000e+00> : vector<128x32xf32>
    %130 = tpu.matmul %127, %129, %cst_80 {dimension_numbers = #tpu.dot_dimension_numbers<[1], [0], [0], [1], [0, 0, 1, 1], [], []>} : vector<128x32xbf16>, vector<32x32xbf16>, vector<128x32xf32> -> vector<128x32xf32>
    %131 = arith.addf %124, %130 : vector<128x32xf32>
    %c0_81 = arith.constant 0 : index
    %c0_82 = arith.constant 0 : index
    %132 = vector.load %arg7[%c0_81, %c0_82] : memref<1x32xf32, #tpu.memory_space<vmem>>, vector<1x32xf32>
    %133 = vector.broadcast %132 : vector<1x32xf32> to vector<128x32xf32>
    %134 = arith.addf %131, %133 : vector<128x32xf32>
    %135 = vector.shape_cast %44 : vector<2x64x32xf32> to vector<128x32xf32>
    %136 = arith.addf %134, %135 : vector<128x32xf32>
    %c0_83 = arith.constant 0 : index
    %c0_84 = arith.constant 0 : index
    %137 = vector.load %arg8[%c0_83, %c0_84] : memref<128x32xf32, #tpu.memory_space<vmem>>, vector<128x32xf32>
    tpu.vector_store %arg8[%c0_83, %c0_84], %136 {strides = array<i32>} : memref<128x32xf32, #tpu.memory_space<vmem>>, vector<128x32xf32>,
    return
  }
}

</mosaic_0001>

<bundles_post_ra>
// kernel: tpu_custom_call.1
= control target key start
LH: loop header
LB: loop body
LE: loop exit
PB: predicated region body
PF: predicated region fallthrough
CT: control target
= control target key end

     0   :  { %vm32_vm0 = vcmask 261120   ;;  %v3174_v14 = vmov 0.0   ;;  %vm3175_vm1 = vmmov 0   ;;  %vm372_vm2 = vcmask 64512   ;;  %s4225_s1 = inlined_call_operand.vmem [shape: f32[2,8,32], index: 1, kind: input, shape index: {}]   ;;  %s4226_s4 = inlined_call_operand.vmem [shape: bf16[32,64], index: 4, kind: input, shape index: {}]   ;;  %s4227_s0 = inlined_call_operand.vmem [shape: f32[2,64,32], index: 0, kind: input, shape index: {}]   ;;  %s4228_s2 = inlined_call_operand.vmem [shape: f32[1,32], index: 2, kind: input, shape index: {}]   ;;  %s4229_s3 = inlined_call_operand.vmem [shape: f32[1,32], index: 3, kind: input, shape index: {}]   ;;  %s4230_s5 = inlined_call_operand.vmem [shape: f32[1,64], index: 5, kind: input, shape index: {}]   ;;  %s4231_s6 = inlined_call_operand.vmem [shape: bf16[3,3,32,32], index: 6, kind: input, shape index: {}]   ;;  %s4232_s7 = inlined_call_operand.vmem [shape: f32[1,32], index: 7, kind: input, shape index: {}]   ;;  %s4233_s8 = inlined_call_operand.vmem [shape: f32[128,32], index: 8, kind: output, shape index: {}]  }
   0x1   :  { %v30_v0 = vld [vmem:[%s4225_s1] sm:$0xff]  ;;  %v31_v1 = vld [vmem:[%s4225_s1 + $0x8] sm:$0xff]  ;;  %2692 = vmatprep.subr.bf16.mxu0 %v3174_v14  ;;  %720 = vst.msk [vmem:[#allocation2] sm:$0xff] %vm32_vm0, %v3174_v14  ;;  %723 = vst.msk [vmem:[#allocation2 + $0x10] sm:$0xff] %vm32_vm0, %v3174_v14  ;;  %2696 = vmatprep.mubr.msk.bf16.mxu0 %vm3175_vm1, %v3174_v14  ;;  %vm571_vm3 = vcmask 1043456   ;;  %vm721_vm4 = vcmask 254976  }
   0x2   :  { %v33_v2 = vsel %vm32_vm0, %v30_v0, 0.0  ;;  %v36_v3 = vsel %vm32_vm0, %v31_v1, 0.0  ;;  %725 = vst.msk [vmem:[#allocation2 + $0x20] sm:$0xff] %vm32_vm0, %v3174_v14  ;;  %727 = vst.msk [vmem:[#allocation2 + $0x30] sm:$0xff] %vm32_vm0, %v3174_v14  ;;  %v3058_v15 = vld [vmem:[%s4226_s4] sm:$0xff]   ;;  %v3059_v16 = vld [vmem:[%s4226_s4 + $0x8] sm:$0xff]   ;;  %v78_v17 = vpack.c.bf16 %v31_v1, %v30_v0 }
   0x3   :  { %34 = vadd.xlane.f32.xlu0 %v33_v2  ;;  %729 = vst.msk [vmem:[#allocation2 + $0x40] sm:$0xff] %vm32_vm0, %v3174_v14  ;;  %731 = vst.msk [vmem:[#allocation2 + $0x50] sm:$0xff] %vm32_vm0, %v3174_v14  ;;  %2693 = vmatpush3.bf16.msra.mxu0 %v3058_v15  ;;  %v170_v18 = vld [vmem:[%s4227_s0] sm:$0xff]  ;;  %v171_v19 = vld [vmem:[%s4227_s0 + $0x8] sm:$0xff]  ;;  %vm862_vm5 = vcmask 1046528   ;;  %vm1206_vm6 = vcmask 1045504  }
   0x4   :  { %733 = vst.msk [vmem:[#allocation2 + $0x60] sm:$0xff] %vm32_vm0, %v3174_v14  ;;  %735 = vst.msk [vmem:[#allocation2 + $0x70] sm:$0xff] %vm32_vm0, %v3174_v14  ;;  %2694 = vmatprep.subr.bf16.mxu0 %v3174_v14  ;;  %v186_v20 = vpack.c.bf16 %v171_v19, %v170_v18  ;;  %v2432_v28 = vld [vmem:[%s4228_s2] ss:$0 sm:$0xff]  ;;  %v172_v39 = vld [vmem:[%s4227_s0 + $0x10] sm:$0xff] }
   0x5   :  { %737 = vst.msk [vmem:[#allocation2 + $0x80] sm:$0xff] %vm32_vm0, %v3174_v14  ;;  %739 = vst.msk [vmem:[#allocation2 + $0x90] sm:$0xff] %vm32_vm0, %v3174_v14  ;;  %v2433_v30 = vld [vmem:[%s4229_s3] ss:$0 sm:$0xff]  ;;  %v173_v40 = vld [vmem:[%s4227_s0 + $0x18] sm:$0xff] }
   0x6   :  { %741 = vst.msk [vmem:[#allocation2 + $0xa0] sm:$0xff] %vm32_vm0, %v3174_v14  ;;  %743 = vst.msk [vmem:[#allocation2 + $0xb0] sm:$0xff] %vm32_vm0, %v3174_v14  ;;  %v174_v42 = vld [vmem:[%s4227_s0 + $0x20] sm:$0xff]  ;;  %v175_v43 = vld [vmem:[%s4227_s0 + $0x28] sm:$0xff]  ;;  %v187_v44 = vpack.c.bf16 %v173_v40, %v172_v39 }
   0x7   :  { %37 = vadd.xlane.f32.xlu0 %v36_v3  ;;  %745 = vst.msk [vmem:[#allocation2 + $0xc0] sm:$0xff] %vm32_vm0, %v3174_v14  ;;  %747 = vst.msk [vmem:[#allocation2 + $0xd0] sm:$0xff] %vm32_vm0, %v3174_v14  ;;  %2695 = vmatpush3.bf16.msra.mxu0 %v3059_v16  ;;  %v188_v45 = vpack.c.bf16 %v175_v43, %v174_v42  ;;  %v176_v47 = vld [vmem:[%s4227_s0 + $0x30] sm:$0xff]  ;;  %v177_v48 = vld [vmem:[%s4227_s0 + $0x38] sm:$0xff] }
   0x8   :  { %749 = vst.msk [vmem:[#allocation2 + $0xe0] sm:$0xff] %vm32_vm0, %v3174_v14  ;;  %751 = vst.msk [vmem:[#allocation2 + $0xf0] sm:$0xff] %vm32_vm0, %v3174_v14  ;;  %v178_v49 = vld [vmem:[%s4227_s0 + $0x40] sm:$0xff]  ;;  %v179_v50 = vld [vmem:[%s4227_s0 + $0x48] sm:$0xff]  ;;  %v189_v51 = vpack.c.bf16 %v177_v48, %v176_v47 }
   0x9   :  { %753 = vst.msk [vmem:[#allocation2 + $0x100] sm:$0xff] %vm32_vm0, %v3174_v14  ;;  %755 = vst.msk [vmem:[#allocation2 + $0x110] sm:$0xff] %vm32_vm0, %v3174_v14  ;;  %v190_v52 = vpack.c.bf16 %v179_v50, %v178_v49  ;;  %v180_v53 = vld [vmem:[%s4227_s0 + $0x50] sm:$0xff]  ;;  %v181_v54 = vld [vmem:[%s4227_s0 + $0x58] sm:$0xff] }
   0xa   :  { %757 = vst.msk [vmem:[#allocation2 + $0x120] sm:$0xff] %vm32_vm0, %v3174_v14  ;;  %759 = vst.msk [vmem:[#allocation2 + $0x130] sm:$0xff] %vm32_vm0, %v3174_v14  ;;  %2697 = vmatmul.mubr.msk.bf16.vlgmr.msra.gmra.mrb[0].mxu0 %vm32_vm0, %v78_v17  ;;  %v182_v55 = vld [vmem:[%s4227_s0 + $0x60] sm:$0xff]  ;;  %v183_v56 = vld [vmem:[%s4227_s0 + $0x68] sm:$0xff]  ;;  %v191_v57 = vpack.c.bf16 %v181_v54, %v180_v53 }
   0xb   :  { %2702 = vmatprep.mubr.msk.bf16.mxu0 %vm32_vm0, %v186_v20  ;;  %v192_v58 = vpack.c.bf16 %v183_v56, %v182_v55  ;;  %v184_v59 = vld [vmem:[%s4227_s0 + $0x70] sm:$0xff]  ;;  %v185_v60 = vld [vmem:[%s4227_s0 + $0x78] sm:$0xff]  ;;  %728 = vst.msk [vmem:[#allocation2 + $0x38] sm:$0x3] %vm721_vm4, %v3174_v14  ;;  %722 = vst.msk [vmem:[#allocation2 + $0x8] sm:$0x3] %vm721_vm4, %v3174_v14 }
   0xc   :  { %v193_v61 = vpack.c.bf16 %v185_v60, %v184_v59  ;;  %724 = vst.msk [vmem:[#allocation2 + $0x18] sm:$0x3] %vm721_vm4, %v3174_v14  ;;  %726 = vst.msk [vmem:[#allocation2 + $0x28] sm:$0x3] %vm721_vm4, %v3174_v14 }
   0xd   :  { %730 = vst.msk [vmem:[#allocation2 + $0x48] sm:$0x3] %vm721_vm4, %v3174_v14  ;;  %732 = vst.msk [vmem:[#allocation2 + $0x58] sm:$0x3] %vm721_vm4, %v3174_v14 }
   0xe   :  { %734 = vst.msk [vmem:[#allocation2 + $0x68] sm:$0x3] %vm721_vm4, %v3174_v14  ;;  %736 = vst.msk [vmem:[#allocation2 + $0x78] sm:$0x3] %vm721_vm4, %v3174_v14 }
   0xf   :  { %738 = vst.msk [vmem:[#allocation2 + $0x88] sm:$0x3] %vm721_vm4, %v3174_v14  ;;  %740 = vst.msk [vmem:[#allocation2 + $0x98] sm:$0x3] %vm721_vm4, %v3174_v14 }
  0x10   :  { %742 = vst.msk [vmem:[#allocation2 + $0xa8] sm:$0x3] %vm721_vm4, %v3174_v14  ;;  %744 = vst.msk [vmem:[#allocation2 + $0xb8] sm:$0x3] %vm721_vm4, %v3174_v14 }
  0x11   :  { %746 = vst.msk [vmem:[#allocation2 + $0xc8] sm:$0x3] %vm721_vm4, %v3174_v14  ;;  %748 = vst.msk [vmem:[#allocation2 + $0xd8] sm:$0x3] %vm721_vm4, %v3174_v14 }
  0x12   :  { %750 = vst.msk [vmem:[#allocation2 + $0xe8] sm:$0x3] %vm721_vm4, %v3174_v14  ;;  %752 = vst.msk [vmem:[#allocation2 + $0xf8] sm:$0x3] %vm721_vm4, %v3174_v14 }
  0x13   :  { %754 = vst.msk [vmem:[#allocation2 + $0x108] sm:$0x3] %vm721_vm4, %v3174_v14  ;;  %756 = vst.msk [vmem:[#allocation2 + $0x118] sm:$0x3] %vm721_vm4, %v3174_v14 }
  0x14   :  { %758 = vst.msk [vmem:[#allocation2 + $0x128] sm:$0x3] %vm721_vm4, %v3174_v14  ;;  %760 = vst.msk [vmem:[#allocation2 + $0x138] sm:$0x3] %vm721_vm4, %v3174_v14  ;;  %v3063_v14 = vld [vmem:[%s4231_s6 + $0x48] sm:$0xff]  }
  0x90   :  { %v35_v4 = vpop.xlane.xlu0 %34 }
  0x91   :  { %v40_v5 = vmul.f32 0.03125, %v35_v4 }
  0x93   :  { %v42_v6 = vsub.f32 %v30_v0, %v40_v5 }
  0x94   :  { %v38_v7 = vpop.xlane.xlu0 %37 }
  0x95   :  { %v41_v8 = vmul.f32 0.03125, %v38_v7  ;;  %v44_v9 = vmul.f32 %v42_v6, %v42_v6 }
  0x97   :  { %v43_v10 = vsub.f32 %v31_v1, %v41_v8  ;;  %v46_v11 = vsel %vm32_vm0, %v44_v9, 0.0 }
  0x98   :  { %47 = vadd.xlane.f32.xlu1 %v46_v11 }
  0x99   :  { %v45_v12 = vmul.f32 %v43_v10, %v43_v10 }
  0x9b   :  { %v49_v13 = vsel %vm32_vm0, %v45_v12, 0.0 }
  0x9c   :  { %50 = vadd.xlane.f32.xlu1 %v49_v13 }
  0xdd   :  { %v3348_v62 = vpop.f32.mrb[0].mxu0 }
  0xde   :  { %v2698_v63 = vpop.f32.mrb[1].mxu0 }
  0xdf   :  { %v3350_v0 = vpop.f32.mrb[2].mxu0 }
  0xe0   :  { %v2699_v1 = vpop.f32.mrb[3].mxu0 }
 0x125   :  { %v48_v21 = vpop.xlane.xlu1 %47 }
 0x126   :  { %v52_v22 = vmul.f32 0.03125, %v48_v21 }
 0x128   :  { %v54_v23 = vadd.f32 1e-05, %v52_v22 }
 0x129   :  { %v51_v24 = vpop.xlane.xlu1 %50 }
 0x12a   :  { %3078 = vrsqrt.f32 %v54_v23  ;;  %v53_v25 = vmul.f32 0.03125, %v51_v24 }
 0x12c   :  { %v55_v26 = vadd.f32 1e-05, %v53_v25 }
 0x12e   :  { %3080 = vrsqrt.f32 %v55_v26 }
 0x134   :  { %v3079_v27 = vpop.eup %3078 }
 0x135   :  { %v58_v29 = vmul.f32 %v3079_v27, %v42_v6 }
 0x137   :  { %v67_v31 = vmul.f32 %v2432_v28, %v58_v29 }
 0x138   :  { %v3081_v32 = vpop.eup %3080 }
 0x139   :  { %v76_v33 = vadd.f32 %v2433_v30, %v67_v31  ;;  %v59_v34 = vmul.f32 %v3081_v32, %v43_v10 }
 0x13b   :  { %v194_v35 = vpack.c.bf16 %v76_v33, %v76_v33  ;;  %v68_v36 = vmul.f32 %v2432_v28, %v59_v34 }
 0x13d   :  { %3050 = vmatprep.subr.msk.bf16.mxu0 %vm32_vm0, %v194_v35  ;;  %v209_v37 = vsel %vm32_vm0, %v194_v35, 0  ;;  %v77_v38 = vadd.f32 %v2433_v30, %v68_v36 }
 0x13e   :  { %2701 = vmatpush3.bf16.xpose.msra.mxu0 %v209_v37 }
 0x13f   :  { %v195_v41 = vpack.c.bf16 %v77_v38, %v77_v38 }
 0x141   :  { %3051 = vmatprep.subr.msk.bf16.mxu0 %vm32_vm0, %v195_v41  ;;  %v289_v46 = vsel %vm32_vm0, %v195_v41, 0 }
 0x145   :  { %2703 = vmatmul.mubr.msk.bf16.vlgmr.msra.gmra.mrb[4].mxu0 %vm32_vm0, %v187_v44 }
 0x146   :  { %2711 = vmatpush3.bf16.xpose.msra.mxu0 %v289_v46  ;;  %2706 = vmatprep.mubr.msk.bf16.mxu0 %vm32_vm0, %v188_v45 }
 0x14d   :  { %2707 = vmatmul.mubr.msk.bf16.gmra.mrb[8].mxu0 %vm32_vm0, %v189_v51 }
 0x14e   :  { %2712 = vmatprep.mubr.msk.bf16.mxu0 %vm32_vm0, %v190_v52 }
 0x155   :  { %2713 = vmatmul.mubr.msk.bf16.vlgmr.msra.gmra.mrb[12].mxu0 %vm32_vm0, %v191_v57 }
 0x156   :  { %2716 = vmatprep.mubr.msk.bf16.mxu0 %vm32_vm0, %v192_v58 }
 0x15d   :  { %2717 = vmatmul.mubr.msk.bf16.gmra.mrb[16].mxu0 %vm32_vm0, %v193_v61 }
 0x218   :  { %v2704_v2 = vpop.f32.mrb[4].mxu0 }
 0x219   :  { %v245_v3 = vpop.f32.mrb[5].mxu0  ;;  %v3354_v7 = vmul.f32 0.17677669, %v2704_v2 }
 0x21a   :  { %v3352_v4 = vmul.f32 0.17677669, %v245_v3  ;;  %v2705_v5 = vpop.f32.mrb[6].mxu0 }
 0x21b   :  { %v248_v6 = vpop.f32.mrb[7].mxu0  ;;  %v3360_v10 = vmul.f32 0.17677669, %v2705_v5  ;;  %v379_v13 = vsel %vm372_vm2, %v3354_v7, -inf }
 0x21c   :  { %v3356_v8 = vmul.f32 0.17677669, %v248_v6  ;;  %v373_v9 = vsel %vm372_vm2, %v3352_v4, -inf }
 0x21d   :  { %374 = vmax.xlane.f32.xlu0 %v373_v9  ;;  %v382_v18 = vsel %vm372_vm2, %v3360_v10, -inf }
 0x21e   :  { %v376_v11 = vsel %vm372_vm2, %v3356_v8, -inf }
 0x21f   :  { %377 = vmax.xlane.f32.xlu1 %v376_v11 }
 0x220   :  { %v2708_v12 = vpop.f32.mrb[8].mxu0 }
 0x221   :  { %380 = vmax.xlane.f32.xlu0 %v379_v13  ;;  %v261_v15 = vpop.f32.mrb[9].mxu0  ;;  %v3370_v20 = vmul.f32 0.17677669, %v2708_v12 }
 0x222   :  { %v3366_v16 = vmul.f32 0.17677669, %v261_v15  ;;  %v2709_v17 = vpop.f32.mrb[10].mxu0 }
 0x223   :  { %383 = vmax.xlane.f32.xlu1 %v382_v18  ;;  %v264_v19 = vpop.f32.mrb[11].mxu0  ;;  %v3376_v23 = vmul.f32 0.17677669, %v2709_v17  ;;  %v391_v26 = vsel %vm372_vm2, %v3370_v20, -inf }
 0x224   :  { %v3372_v21 = vmul.f32 0.17677669, %v264_v19  ;;  %v385_v22 = vsel %vm372_vm2, %v3366_v16, -inf }
 0x225   :  { %386 = vmax.xlane.f32.xlu0 %v385_v22  ;;  %v394_v30 = vsel %vm372_vm2, %v3376_v23, -inf }
 0x226   :  { %v388_v24 = vsel %vm372_vm2, %v3372_v21, -inf }
 0x227   :  { %389 = vmax.xlane.f32.xlu1 %v388_v24 }
 0x228   :  { %v2714_v25 = vpop.f32.mrb[12].mxu0 }
 0x229   :  { %392 = vmax.xlane.f32.xlu0 %v391_v26  ;;  %v325_v27 = vpop.f32.mrb[13].mxu0  ;;  %v3386_v32 = vmul.f32 0.17677669, %v2714_v25 }
 0x22a   :  { %v3382_v28 = vmul.f32 0.17677669, %v325_v27  ;;  %v2715_v29 = vpop.f32.mrb[14].mxu0 }
 0x22b   :  { %395 = vmax.xlane.f32.xlu1 %v394_v30  ;;  %v328_v31 = vpop.f32.mrb[15].mxu0  ;;  %v3392_v35 = vmul.f32 0.17677669, %v2715_v29  ;;  %v403_v38 = vsel %vm372_vm2, %v3386_v32, -inf  ;;  %v2434_v30 = vld [vmem:[%s4230_s5] ss:$0 sm:$0xff] }
 0x22c   :  { %v3388_v33 = vmul.f32 0.17677669, %v328_v31  ;;  %v397_v34 = vsel %vm372_vm2, %v3382_v28, -inf  ;;  %s3176_s5 = smov 96  }
 0x22d   :  { %398 = vmax.xlane.f32.xlu0 %v397_v34  ;;  %v406_v42 = vsel %vm372_vm2, %v3392_v35, -inf }
 0x22e   :  { %v400_v36 = vsel %vm372_vm2, %v3388_v33, -inf }
 0x22f   :  { %401 = vmax.xlane.f32.xlu1 %v400_v36 }
 0x230   :  { %v2718_v37 = vpop.f32.mrb[16].mxu0 }
 0x231   :  { %404 = vmax.xlane.f32.xlu0 %v403_v38  ;;  %v341_v39 = vpop.f32.mrb[17].mxu0  ;;  %v3402_v44 = vmul.f32 0.17677669, %v2718_v37 }
 0x232   :  { %v3398_v40 = vmul.f32 0.17677669, %v341_v39  ;;  %v2719_v41 = vpop.f32.mrb[18].mxu0 }
 0x233   :  { %407 = vmax.xlane.f32.xlu1 %v406_v42  ;;  %v344_v43 = vpop.f32.mrb[19].mxu0  ;;  %v3408_v47 = vmul.f32 0.17677669, %v2719_v41  ;;  %v415_v49 = vsel %vm372_vm2, %v3402_v44, -inf }
 0x234   :  { %v3404_v45 = vmul.f32 0.17677669, %v344_v43  ;;  %v409_v46 = vsel %vm372_vm2, %v3398_v40, -inf }
 0x235   :  { %410 = vmax.xlane.f32.xlu0 %v409_v46  ;;  %v418_v50 = vsel %vm372_vm2, %v3408_v47, -inf }
 0x236   :  { %v412_v48 = vsel %vm372_vm2, %v3404_v45, -inf }
 0x237   :  { %413 = vmax.xlane.f32.xlu1 %v412_v48 }
 0x239   :  { %416 = vmax.xlane.f32.xlu0 %v415_v49 }
 0x23b   :  { %419 = vmax.xlane.f32.xlu1 %v418_v50 }
 0x2aa   :  { %v375_v51 = vpop.xlane.xlu0 %374 }
 0x2ab   :  { %v421_v52 = vsub.f32 %v3352_v4, %v375_v51 }
 0x2ac   :  { %v378_v53 = vpop.xlane.xlu1 %377 }
 0x2ad   :  { %v422_v55 = vsub.f32 %v3356_v8, %v378_v53  ;;  %v437_v57 = vmul.f32 1.442695, %v421_v52 }
 0x2ae   :  { %v381_v54 = vpop.xlane.xlu0 %380 }
 0x2af   :  { %v423_v56 = vsub.f32 %v3354_v7, %v381_v54  ;;  %v439_v63 = vmul.f32 1.442695, %v422_v55 }
 0x2b0   :  { %v384_v58 = vpop.xlane.xlu1 %383 }
 0x2b1   :  { %v441_v59 = vmul.f32 1.442695, %v423_v56  ;;  %v424_v60 = vsub.f32 %v3360_v10, %v384_v58 }
 0x2b2   :  { %v387_v61 = vpop.xlane.xlu0 %386 }
 0x2b3   :  { %3082 = vpow2.f32 %v441_v59  ;;  %v443_v1 = vmul.f32 1.442695, %v424_v60  ;;  %v425_v2 = vsub.f32 %v3366_v16, %v387_v61 }
 0x2b4   :  { %3084 = vpow2.f32 %v437_v57  ;;  %v390_v3 = vpop.xlane.xlu1 %389 }
 0x2b5   :  { %3086 = vpow2.f32 %v443_v1  ;;  %v426_v5 = vsub.f32 %v3372_v21, %v390_v3  ;;  %v445_v7 = vmul.f32 1.442695, %v425_v2 }
 0x2b6   :  { %v393_v4 = vpop.xlane.xlu0 %392  ;;  %3088 = vpow2.f32 %v439_v63  ;;  %v3484_v63 = vadd.f32 %v2434_v30, %v3350_v0 }
 0x2b7   :  { %v427_v6 = vsub.f32 %v3370_v20, %v393_v4  ;;  %v447_v12 = vmul.f32 1.442695, %v426_v5 }
 0x2b8   :  { %v396_v8 = vpop.xlane.xlu1 %395  ;;  %v2439_v4 = vmul.f32 -1.442695, %v3484_v63 }
 0x2b9   :  { %v449_v9 = vmul.f32 1.442695, %v427_v6  ;;  %v428_v10 = vsub.f32 %v3376_v23, %v396_v8 }
 0x2ba   :  { %v399_v11 = vpop.xlane.xlu0 %398 }
 0x2bb   :  { %3090 = vpow2.f32 %v449_v9  ;;  %v451_v13 = vmul.f32 1.442695, %v428_v10  ;;  %v429_v15 = vsub.f32 %v3382_v28, %v399_v11 }
 0x2bc   :  { %3092 = vpow2.f32 %v445_v7  ;;  %v402_v16 = vpop.xlane.xlu1 %401 }
 0x2bd   :  { %v3425_v17 = vpop.eup %3082  ;;  %3094 = vpow2.f32 %v451_v13  ;;  %v430_v22 = vsub.f32 %v3388_v33, %v402_v16  ;;  %v453_v24 = vmul.f32 1.442695, %v429_v15 }
 0x2be   :  { %v3427_v18 = vpop.eup %3084  ;;  %v405_v19 = vpop.xlane.xlu0 %404  ;;  %v475_v20 = vsel %vm372_vm2, %v3425_v17, 0.0  ;;  %3096 = vpow2.f32 %v447_v12 }
 0x2bf   :  { %v3431_v21 = vpop.eup %3086  ;;  %v431_v23 = vsub.f32 %v3386_v32, %v405_v19  ;;  %476 = vadd.xlane.f32.xlu0 %v475_v20  ;;  %v469_v32 = vsel %vm372_vm2, %v3427_v18, 0.0  ;;  %v455_v33 = vmul.f32 1.442695, %v430_v22 }
 0x2c0   :  { %v408_v25 = vpop.xlane.xlu1 %407  ;;  %v478_v26 = vsel %vm372_vm2, %v3431_v21, 0.0  ;;  %v3437_v27 = vpop.eup %3088 }
 0x2c1   :  { %v457_v28 = vmul.f32 1.442695, %v431_v23  ;;  %v432_v29 = vsub.f32 %v3392_v35, %v408_v25  ;;  %479 = vadd.xlane.f32.xlu1 %v478_v26  ;;  %v472_v37 = vsel %vm372_vm2, %v3437_v27, 0.0  ;;  %v3450_v35 = vadd.f32 %v2434_v30, %v3348_v62 }
 0x2c2   :  { %v411_v31 = vpop.xlane.xlu0 %410 }
 0x2c3   :  { %3098 = vpow2.f32 %v457_v28  ;;  %v459_v34 = vmul.f32 1.442695, %v432_v29  ;;  %470 = vadd.xlane.f32.xlu0 %v469_v32  ;;  %v433_v46 = vsub.f32 %v3398_v40, %v411_v31  ;;  %v2438_v51 = vmul.f32 -1.442695, %v3450_v35 }
 0x2c4   :  { %3100 = vpow2.f32 %v453_v24  ;;  %v414_v36 = vpop.xlane.xlu1 %413 }
 0x2c5   :  { %v3447_v38 = vpop.eup %3090  ;;  %3102 = vpow2.f32 %v459_v34  ;;  %473 = vadd.xlane.f32.xlu1 %v472_v37  ;;  %v461_v54 = vmul.f32 1.442695, %v433_v46  ;;  %v434_v59 = vsub.f32 %v3404_v45, %v414_v36 }
 0x2c6   :  { %v3452_v39 = vpop.eup %3092  ;;  %v417_v41 = vpop.xlane.xlu0 %416  ;;  %v487_v42 = vsel %vm372_vm2, %v3447_v38, 0.0  ;;  %3104 = vpow2.f32 %v455_v33 }
 0x2c7   :  { %v3456_v43 = vpop.eup %3094  ;;  %v435_v48 = vsub.f32 %v3402_v44, %v417_v41  ;;  %488 = vadd.xlane.f32.xlu0 %v487_v42  ;;  %v481_v53 = vsel %vm372_vm2, %v3452_v39, 0.0  ;;  %v463_v2 = vmul.f32 1.442695, %v434_v59 }
 0x2c8   :  { %v420_v49 = vpop.xlane.xlu1 %419  ;;  %v490_v62 = vsel %vm372_vm2, %v3456_v43, 0.0  ;;  %v3462_v50 = vpop.eup %3096 }
 0x2c9   :  { %v465_v52 = vmul.f32 1.442695, %v435_v48  ;;  %491 = vadd.xlane.f32.xlu1 %v490_v62  ;;  %v436_v40 = vsub.f32 %v3408_v47, %v420_v49  ;;  %v484_v44 = vsel %vm372_vm2, %v3462_v50, 0.0 }
 0x2cb   :  { %3106 = vpow2.f32 %v465_v52  ;;  %482 = vadd.xlane.f32.xlu0 %v481_v53  ;;  %v467_v60 = vmul.f32 1.442695, %v436_v40 }
 0x2cc   :  { %3108 = vpow2.f32 %v2438_v51 }
 0x2cd   :  { %v3470_v55 = vpop.eup %3098  ;;  %485 = vadd.xlane.f32.xlu1 %v484_v44  ;;  %3110 = vpow2.f32 %v461_v54 }
 0x2ce   :  { %v3472_v56 = vpop.eup %3100  ;;  %v499_v57 = vsel %vm372_vm2, %v3470_v55, 0.0  ;;  %3112 = vpow2.f32 %v467_v60 }
 0x2cf   :  { %v3476_v58 = vpop.eup %3102  ;;  %500 = vadd.xlane.f32.xlu0 %v499_v57  ;;  %v493_v1 = vsel %vm372_vm2, %v3472_v56, 0.0  ;;  %3114 = vpow2.f32 %v463_v2 }
 0x2d0   :  { %v502_v47 = vsel %vm372_vm2, %v3476_v58, 0.0  ;;  %v3481_v61 = vpop.eup %3104  ;;  %3116 = vpow2.f32 %v2439_v4 }
 0x2d1   :  { %503 = vadd.xlane.f32.xlu1 %v502_v47  ;;  %v496_v45 = vsel %vm372_vm2, %v3481_v61, 0.0 }
 0x2d3   :  { %494 = vadd.xlane.f32.xlu0 %v493_v1 }
 0x2d5   :  { %v3490_v3 = vpop.eup %3106  ;;  %497 = vadd.xlane.f32.xlu1 %v496_v45 }
 0x2d6   :  { %v3109_v5 = vpop.eup %3108  ;;  %v511_v0 = vsel %vm372_vm2, %v3490_v3, 0.0 }
 0x2d7   :  { %v3495_v6 = vpop.eup %3110  ;;  %v154_v7 = vadd.f32 1.0, %v3109_v5 }
 0x2d8   :  { %v505_v8 = vsel %vm372_vm2, %v3495_v6, 0.0  ;;  %v3499_v9 = vpop.eup %3112 }
 0x2d9   :  { %512 = vadd.xlane.f32.xlu1 %v511_v0  ;;  %3118 = vrcp.f32 %v154_v7  ;;  %v514_v10 = vsel %vm372_vm2, %v3499_v9, 0.0  ;;  %v3503_v11 = vpop.eup %3114 }
 0x2da   :  { %v3117_v12 = vpop.eup %3116  ;;  %v508_v13 = vsel %vm372_vm2, %v3503_v11, 0.0 }
 0x2db   :  { %v155_v15 = vadd.f32 1.0, %v3117_v12 }
 0x2dd   :  { %506 = vadd.xlane.f32.xlu1 %v505_v8  ;;  %3120 = vrcp.f32 %v155_v15 }
 0x2e1   :  { %515 = vadd.xlane.f32.xlu1 %v514_v10 }
 0x2e3   :  { %v3119_v16 = vpop.eup %3118 }
 0x2e5   :  { %509 = vadd.xlane.f32.xlu1 %v508_v13 }
 0x2e7   :  { %v3121_v19 = vpop.eup %3120 }
 0x2e9   :  { %162 = vrot.lane.b32.xlu0 %v3119_v16, %s3176_s5 }
 0x2f6   :  { %164 = vrot.lane.b32.xlu1 %v3121_v19, %s3176_s5 }
 0x34c   :  { %v477_v20 = vpop.xlane.xlu0 %476 }
 0x34e   :  { %v480_v22 = vpop.xlane.xlu1 %479 }
 0x350   :  { %v471_v23 = vpop.xlane.xlu0 %470 }
 0x351   :  { %3122 = vrcp.f32 %v471_v23 }
 0x352   :  { %v474_v24 = vpop.xlane.xlu1 %473 }
 0x353   :  { %3124 = vrcp.f32 %v474_v24 }
 0x354   :  { %v489_v25 = vpop.xlane.xlu0 %488  ;;  %3126 = vtanh.f32 %v3450_v35 }
 0x355   :  { %3128 = vrcp.f32 %v480_v22 }
 0x356   :  { %v492_v26 = vpop.xlane.xlu1 %491 }
 0x358   :  { %v483_v28 = vpop.xlane.xlu0 %482 }
 0x35a   :  { %v486_v29 = vpop.xlane.xlu1 %485 }
 0x35b   :  { %v3123_v30 = vpop.eup %3122  ;;  %3130 = vrcp.f32 %v486_v29  ;;  %v3599_v29 = vld [vmem:[%s4231_s6] sm:$0xff]  }
 0x35c   :  { %3132 = vrcp.f32 %v477_v20  ;;  %v501_v31 = vpop.xlane.xlu0 %500  ;;  %v533_v34 = vmul.f32 %v3123_v30, %v3427_v18 }
 0x35d   :  { %v3125_v32 = vpop.eup %3124  ;;  %3134 = vrcp.f32 %v483_v28 }
 0x35e   :  { %v504_v33 = vpop.xlane.xlu1 %503  ;;  %v534_v36 = vmul.f32 %v3125_v32, %v3437_v27  ;;  %v3127_v42 = vpop.eup %3126 }
 0x35f   :  { %v3129_v46 = vpop.eup %3128 }
 0x360   :  { %v495_v37 = vpop.xlane.xlu0 %494  ;;  %v549_v41 = vpack.c.bf16 %v534_v36, %v533_v34  ;;  %v536_v27 = vmul.f32 %v3129_v46, %v3431_v21  ;;  %v3605_v34 = vld [vmem:[#allocation2] sm:$0xff]  ;;  %v3607_v36 = vld [vmem:[#allocation2 + $0x8] sm:$0x3] }
 0x361   :  { %3136 = vrcp.f32 %v495_v37  ;;  %v863_v37 = vrot.slane %v3605_v34, 1 }
 0x362   :  { %3138 = vrcp.f32 %v492_v26  ;;  %2722 = vmatprep.mubr.msk.bf16.mxu1 %vm372_vm2, %v549_v41  ;;  %v498_v35 = vpop.xlane.xlu1 %497  ;;  %v864_v41 = vrot.slane %v3607_v36, 1 }
 0x363   :  { %3140 = vrcp.f32 %v498_v35 }
 0x364   :  { %3142 = vrcp.f32 %v489_v25  ;;  %v163_v48 = vpop.permute.xlu0 %162 }
 0x365   :  { %v3131_v49 = vpop.eup %3130  ;;  %v168_v62 = vmul.f32 %v3127_v42, %v163_v48  ;;  %3144 = vtanh.f32 %v3484_v63 }
 0x366   :  { %v3133_v51 = vpop.eup %3132  ;;  %v513_v52 = vpop.xlane.xlu1 %512  ;;  %v538_v54 = vmul.f32 %v3131_v49, %v3462_v50  ;;  %3146 = vrcp.f32 %v504_v33 }
 0x367   :  { %v3135_v18 = vpop.eup %3134  ;;  %v557_v53 = vpack.c.bf16 %v168_v62, %v168_v62  ;;  %v535_v44 = vmul.f32 %v3133_v51, %v3425_v17  ;;  %3148 = vrcp.f32 %v501_v31 }
 0x368   :  { %v537_v59 = vmul.f32 %v3135_v18, %v3452_v39 }
 0x369   :  { %3052 = vmatprep.subr.msk.bf16.mxu1 %vm571_vm3, %v557_v53  ;;  %v573_v40 = vsel %vm571_vm3, %v557_v53, 0  ;;  %v550_v47 = vpack.c.bf16 %v536_v27, %v535_v44  ;;  %v865_v53 = vsel %vm862_vm5, %v863_v37, %v864_v41 }
 0x36a   :  { %2721 = vmatpush3.bf16.msra.mxu1 %v573_v40  ;;  %v507_v57 = vpop.xlane.xlu1 %506  ;;  %v551_v2 = vpack.c.bf16 %v538_v54, %v537_v59 }
 0x36b   :  { %v3137_v60 = vpop.eup %3136 }
 0x36c   :  { %v3139_v1 = vpop.eup %3138  ;;  %v541_v17 = vmul.f32 %v3137_v60, %v3472_v56 }
 0x36d   :  { %v3141_v21 = vpop.eup %3140  ;;  %2723 = vmatmul.mubr.msk.bf16.vlgmr.msra.gmra.mrb[0].mxu1 %vm372_vm2, %v550_v47  ;;  %v540_v39 = vmul.f32 %v3139_v1, %v3456_v43 }
 0x36e   :  { %v3143_v50 = vpop.eup %3142  ;;  %2726 = vmatprep.mubr.msk.bf16.mxu1 %vm372_vm2, %v551_v2  ;;  %v516_v45 = vpop.xlane.xlu1 %515  ;;  %v542_v4 = vmul.f32 %v3141_v21, %v3481_v61 }
 0x36f   :  { %3150 = vrcp.f32 %v516_v45  ;;  %v539_v5 = vmul.f32 %v3143_v50, %v3447_v38  ;;  %v3145_v8 = vpop.eup %3144 }
 0x370   :  { %v553_v63 = vpack.c.bf16 %v542_v4, %v541_v17  ;;  %3152 = vrcp.f32 %v507_v57  ;;  %v3147_v10 = vpop.eup %3146 }
 0x371   :  { %3154 = vrcp.f32 %v513_v52  ;;  %v552_v7 = vpack.c.bf16 %v540_v39, %v539_v5  ;;  %v3149_v61 = vpop.eup %3148  ;;  %v544_v43 = vmul.f32 %v3147_v10, %v3476_v58 }
 0x372   :  { %2732 = vmatprep.mubr.msk.bf16.mxu0 %vm372_vm2, %v553_v63  ;;  %v510_v0 = vpop.xlane.xlu1 %509  ;;  %v543_v38 = vmul.f32 %v3149_v61, %v3470_v55 }
 0x373   :  { %3156 = vrcp.f32 %v510_v0 }
 0x374   :  { %v554_v23 = vpack.c.bf16 %v544_v43, %v543_v38 }
 0x375   :  { %2727 = vmatmul.mubr.msk.bf16.gmra.mrb[4].mxu1 %vm372_vm2, %v552_v7  ;;  %v3066_v7 = vld [vmem:[%s4231_s6 + $0x8] sm:$0xff]  }
 0x376   :  { %v165_v56 = vpop.permute.xlu1 %164 }
 0x377   :  { %v169_v12 = vmul.f32 %v3145_v8, %v165_v56 }
 0x379   :  { %v558_v13 = vpack.c.bf16 %v169_v12, %v169_v12  ;;  %v3151_v15 = vpop.eup %3150  ;;  %v3067_v12 = vld [vmem:[%s4231_s6 + $0x58] sm:$0xff]  }
 0x37a   :  { %v3153_v16 = vpop.eup %3152  ;;  %v548_v24 = vmul.f32 %v3151_v15, %v3499_v9  ;;  %v3062_v9 = vld [vmem:[%s4231_s6 + $0x18] sm:$0xff]  }
 0x37b   :  { %3053 = vmatprep.subr.msk.bf16.mxu0 %vm571_vm3, %v558_v13  ;;  %3054 = vmatprep.subr.msk.bf16.mxu1 %vm571_vm3, %v558_v13  ;;  %v653_v19 = vsel %vm571_vm3, %v558_v13, 0  ;;  %v3155_v20 = vpop.eup %3154  ;;  %v545_v58 = vmul.f32 %v3153_v16, %v3495_v6  ;;  %v3061_v6 = vld [vmem:[%s4231_s6 + $0x40] sm:$0xff]  }
 0x37c   :  { %2731 = vmatpush3.bf16.msra.mxu0 %v653_v19  ;;  %2921 = vmatpush3.bf16.msra.mxu1 %v653_v19  ;;  %v547_v26 = vmul.f32 %v3155_v20, %v3490_v3  ;;  %v3060_v3 = vld [vmem:[%s4231_s6 + $0x10] sm:$0xff]  }
 0x37d   :  { %v3157_v22 = vpop.eup %3156  ;;  %2740 = vmatprep.subr.bf16.mxu0 %v3060_v3  ;;  %2820 = vmatprep.subr.bf16.mxu1 %v3061_v6 }
 0x37e   :  { %v546_v25 = vmul.f32 %v3157_v22, %v3503_v11  ;;  %v556_v28 = vpack.c.bf16 %v548_v24, %v547_v26  ;;  %v3593_v11 = vld [vmem:[%s4231_s6 + $0x50] sm:$0xff]  }
 0x37f   :  { %2733 = vmatmul.mubr.msk.bf16.vlgmr.msra.gmra.mrb[20].mxu0 %vm372_vm2, %v554_v23 }
 0x380   :  { %v555_v55 = vpack.c.bf16 %v546_v25, %v545_v58  ;;  %2741 = vmatpush3.bf16.msra.mxu0 %v3060_v3 }
 0x381   :  { %2742 = vmatprep.subr.bf16.mxu0 %v3062_v9 }
 0x382   :  { %2736 = vmatprep.mubr.msk.bf16.mxu1 %vm372_vm2, %v555_v55 }
 0x383   :  { %2737 = vmatmul.mubr.msk.bf16.vlgmr.msra.gmra.mrb[8].mxu1 %vm372_vm2, %v556_v28 }
 0x384   :  { %2821 = vmatpush3.bf16.msra.mxu1 %v3061_v6  ;;  %2743 = vmatpush3.bf16.msra.mxu0 %v3062_v9  ;;  %v3692_v9 = vld [vmem:[%s4231_s6 + $0x60] sm:$0xff]  }
 0x385   :  { %2822 = vmatprep.subr.bf16.mxu1 %v3063_v14  ;;  %2760 = vmatprep.subr.bf16.mxu0 %v3599_v29 }
 0x388   :  { %2823 = vmatpush3.bf16.msra.mxu1 %v3063_v14  ;;  %v3697_v14 = vld [vmem:[%s4231_s6 + $0x20] sm:$0xff]  }
 0x389   :  { %2840 = vmatprep.subr.bf16.mxu1 %v3593_v11 }
 0x440   :  { %v2724_v30 = vpop.f32.mrb[0].mxu1 }
 0x441   :  { %764 = vst.msk [vmem:[#allocation2 + $0x31] sm:$0xff] %vm32_vm0, %v2724_v30  ;;  %v609_v31 = vpop.f32.mrb[1].mxu1 }
 0x442   :  { %762 = vst.msk [vmem:[#allocation2 + $0x11] sm:$0xff] %vm32_vm0, %v609_v31  ;;  %v2725_v32 = vpop.f32.mrb[2].mxu1  ;;  %v3705_v31 = vld [vmem:[#allocation2 + $0xa0] sm:$0xff] }
 0x443   :  { %765 = vst.msk [vmem:[#allocation2 + $0x41] sm:$0xff] %vm32_vm0, %v2725_v32  ;;  %v612_v33 = vpop.f32.mrb[3].mxu1  ;;  %v3707_v32 = vld [vmem:[#allocation2 + $0xa8] sm:$0x3] }
 0x444   :  { %763 = vst.msk [vmem:[#allocation2 + $0x21] sm:$0xff] %vm32_vm0, %v612_v33 }
 0x448   :  { %v2728_v35 = vpop.f32.mrb[4].mxu1  ;;  %v3612_v42 = vld [vmem:[#allocation2 + $0x30] sm:$0xff]  ;;  %v3614_v46 = vld [vmem:[#allocation2 + $0x38] sm:$0x3] }
 0x449   :  { %768 = vst.msk [vmem:[#allocation2 + $0x71] sm:$0xff] %vm32_vm0, %v2728_v35  ;;  %v625_v48 = vpop.f32.mrb[5].mxu1  ;;  %v3617_v49 = vld [vmem:[#allocation2 + $0x10] sm:$0xff]  ;;  %v3619_v62 = vld [vmem:[#allocation2 + $0x18] sm:$0x3]  ;;  %v872_v51 = vrot.slane %v3612_v42, 1 }
 0x44a   :  { %v873_v52 = vrot.slane %v3614_v46, 1  ;;  %766 = vst.msk [vmem:[#allocation2 + $0x51] sm:$0xff] %vm32_vm0, %v625_v48  ;;  %v2729_v18 = vpop.f32.mrb[6].mxu1  ;;  %v866_v27 = vrot.slane %v3617_v49, 1  ;;  %v867_v54 = vrot.slane %v3619_v62, 1  ;;  %v3627_v40 = vld [vmem:[#allocation2 + $0x40] sm:$0xff] }
 0x44b   :  { %v3629_v44 = vld [vmem:[#allocation2 + $0x48] sm:$0x3]  ;;  %769 = vst.msk [vmem:[#allocation2 + $0x81] sm:$0xff] %vm32_vm0, %v2729_v18  ;;  %v628_v57 = vpop.f32.mrb[7].mxu1  ;;  %v3632_v59 = vld [vmem:[#allocation2 + $0x20] sm:$0xff]  ;;  %v875_v47 = vrot.slane %v3627_v40, 1  ;;  %v1434_v2 = vpack.c.bf16 %v3627_v40, %v3612_v42 }
 0x44c   :  { %v3634_v60 = vld [vmem:[#allocation2 + $0x28] sm:$0x3]  ;;  %v876_v1 = vrot.slane %v3629_v44, 1  ;;  %767 = vst.msk [vmem:[#allocation2 + $0x61] sm:$0xff] %vm32_vm0, %v628_v57  ;;  %v868_v21 = vsel %vm862_vm5, %v866_v27, %v867_v54  ;;  %v869_v50 = vrot.slane %v3632_v59, 1  ;;  %v874_v63 = vsel %vm862_vm5, %v872_v51, %v873_v52 }
 0x44d   :  { %v870_v45 = vrot.slane %v3634_v60, 1  ;;  %v927_v17 = vpack.c.bf16 %v868_v21, %v865_v53  ;;  %v887_v53 = vrot.slane %v3705_v31, 1  ;;  %v888_v27 = vrot.slane %v3707_v32, 1 }
 0x44e   :  { %v877_v4 = vsel %vm862_vm5, %v875_v47, %v876_v1  ;;  %v1433_v1 = vpack.c.bf16 %v3632_v59, %v3617_v49 }
 0x44f   :  { %v871_v39 = vsel %vm862_vm5, %v869_v50, %v870_v45  ;;  %2744 = vmatprep.mubr.msk.bf16.mxu0 %vm32_vm0, %v927_v17  ;;  %v1608_v8 = vpack.c.bf16 %v877_v4, %v874_v63 }
 0x450   :  { %v3648_v5 = vpack.c.bf16 %v874_v63, %v871_v39  ;;  %v1607_v0 = vpack.c.bf16 %v871_v39, %v868_v21  ;;  %v3653_v10 = vld [vmem:[#allocation2 + $0x70] sm:$0xff]  ;;  %v3655_v56 = vld [vmem:[#allocation2 + $0x78] sm:$0x3] }
 0x451   :  { %v3663_v61 = vld [vmem:[#allocation2 + $0x50] sm:$0xff]  ;;  %v3665_v43 = vld [vmem:[#allocation2 + $0x58] sm:$0x3]  ;;  %v884_v13 = vrot.slane %v3653_v10, 1  ;;  %v885_v15 = vrot.slane %v3655_v56, 1 }
 0x452   :  { %2745 = vmatmul.mubr.msk.bf16.vlgmr.msra.gmra.mrb[24].mxu0 %vm32_vm0, %v3648_v5  ;;  %2824 = vmatprep.mubr.msk.bf16.mxu1 %vm32_vm0, %v1607_v0  ;;  %v2734_v16 = vpop.f32.mrb[20].mxu0  ;;  %v878_v38 = vrot.slane %v3663_v61, 1  ;;  %v879_v19 = vrot.slane %v3665_v43, 1  ;;  %v3672_v20 = vld [vmem:[#allocation2 + $0x80] sm:$0xff]  ;;  %v3674_v22 = vld [vmem:[#allocation2 + $0x88] sm:$0x3] }
 0x453   :  { %2825 = vmatmul.mubr.msk.bf16.vlgmr.msra.gmra.mrb[12].mxu1 %vm32_vm0, %v1608_v8  ;;  %2761 = vmatpush3.bf16.msra.mxu0 %v3599_v29  ;;  %772 = vst.msk [vmem:[#allocation2 + $0xd1] sm:$0xff] %vm32_vm0, %v2734_v16  ;;  %v689_v23 = vpop.f32.mrb[21].mxu0  ;;  %v3678_v24 = vld [vmem:[#allocation2 + $0x60] sm:$0xff]  ;;  %v3680_v58 = vld [vmem:[#allocation2 + $0x68] sm:$0x3]  ;;  %v1599_v25 = vrot.slane %v3672_v20, 1  ;;  %v886_v41 = vsel %vm862_vm5, %v884_v13, %v885_v15 }
 0x454   :  { %v1600_v26 = vrot.slane %v3674_v22, 1  ;;  %2841 = vmatpush3.bf16.msra.mxu1 %v3593_v11  ;;  %2762 = vmatprep.subr.bf16.mxu0 %v3066_v7  ;;  %770 = vst.msk [vmem:[#allocation2 + $0xb1] sm:$0xff] %vm32_vm0, %v689_v23  ;;  %v2735_v55 = vpop.f32.mrb[22].mxu0  ;;  %v880_v28 = vsel %vm862_vm5, %v878_v38, %v879_v19  ;;  %v881_v3 = vrot.slane %v3678_v24, 1  ;;  %v882_v6 = vrot.slane %v3680_v58, 1 }
 0x455   :  { %2842 = vmatprep.subr.bf16.mxu1 %v3067_v12  ;;  %773 = vst.msk [vmem:[#allocation2 + $0xe1] sm:$0xff] %vm32_vm0, %v2735_v55  ;;  %v692_v11 = vpop.f32.mrb[23].mxu0  ;;  %v3700_v29 = vpack.c.bf16 %v880_v28, %v877_v4  ;;  %v889_v4 = vsel %vm862_vm5, %v887_v53, %v888_v27 }
 0x456   :  { %v3703_v30 = vsel %vm862_vm5, %v1599_v25, %v1600_v26  ;;  %771 = vst.msk [vmem:[#allocation2 + $0xc1] sm:$0xff] %vm32_vm0, %v692_v11  ;;  %v2738_v33 = vpop.f32.mrb[8].mxu1  ;;  %v883_v37 = vsel %vm862_vm5, %v881_v3, %v882_v6 }
 0x457   :  { %2763 = vmatpush3.bf16.msra.mxu0 %v3066_v7  ;;  %776 = vst.msk [vmem:[#allocation2 + $0x111] sm:$0xff] %vm32_vm0, %v2738_v33  ;;  %v705_v35 = vpop.f32.mrb[9].mxu1  ;;  %2748 = vmatprep.mubr.msk.bf16.mxu0 %vm32_vm0, %v3700_v29  ;;  %v3715_v48 = vpack.c.bf16 %v886_v41, %v883_v37  ;;  %v1609_v51 = vpack.c.bf16 %v883_v37, %v880_v28 }
 0x458   :  { %2843 = vmatpush3.bf16.msra.mxu1 %v3067_v12  ;;  %774 = vst.msk [vmem:[#allocation2 + $0xf1] sm:$0xff] %vm32_vm0, %v705_v35  ;;  %v2739_v52 = vpop.f32.mrb[10].mxu1  ;;  %v1610_v18 = vpack.c.bf16 %v3703_v30, %v886_v41  ;;  %2780 = vmatprep.subr.bf16.mxu0 %v3697_v14 }
 0x459   :  { %2860 = vmatprep.subr.bf16.mxu1 %v3692_v9  ;;  %777 = vst.msk [vmem:[#allocation2 + $0x121] sm:$0xff] %vm32_vm0, %v2739_v52  ;;  %v708_v54 = vpop.f32.mrb[11].mxu1  ;;  %2828 = vmatprep.mubr.msk.bf16.mxu1 %vm32_vm0, %v1609_v51 }
 0x45a   :  { %2749 = vmatmul.mubr.msk.bf16.gmra.mrb[28].mxu0 %vm32_vm0, %v3715_v48  ;;  %775 = vst.msk [vmem:[#allocation2 + $0x101] sm:$0xff] %vm32_vm0, %v708_v54  ;;  %v3729_v57 = vld [vmem:[#allocation2 + $0xd0] sm:$0xff]  ;;  %v3731_v47 = vld [vmem:[#allocation2 + $0xd8] sm:$0x3] }
 0x45b   :  { %2829 = vmatmul.mubr.msk.bf16.gmra.mrb[16].mxu1 %vm32_vm0, %v1610_v18  ;;  %v3737_v50 = vld [vmem:[#allocation2 + $0xb0] sm:$0xff]  ;;  %v3739_v45 = vld [vmem:[#allocation2 + $0xb8] sm:$0x3]  ;;  %v896_v17 = vrot.slane %v3729_v57, 1  ;;  %v897_v0 = vrot.slane %v3731_v47, 1 }
 0x45c   :  { %v890_v39 = vrot.slane %v3737_v50, 1  ;;  %v891_v63 = vrot.slane %v3739_v45, 1  ;;  %v3746_v7 = vld [vmem:[#allocation2 + $0xe0] sm:$0xff]  ;;  %v3748_v8 = vld [vmem:[#allocation2 + $0xe8] sm:$0x3] }
 0x45d   :  { %v3750_v12 = vld [vmem:[#allocation2 + $0xc0] sm:$0xff]  ;;  %v3752_v13 = vld [vmem:[#allocation2 + $0xc8] sm:$0x3]  ;;  %v899_v15 = vrot.slane %v3746_v7, 1  ;;  %v900_v16 = vrot.slane %v3748_v8, 1  ;;  %v898_v6 = vsel %vm862_vm5, %v896_v17, %v897_v0 }
 0x45e   :  { %v892_v38 = vsel %vm862_vm5, %v890_v39, %v891_v63  ;;  %v893_v19 = vrot.slane %v3750_v12, 1  ;;  %v894_v23 = vrot.slane %v3752_v13, 1  ;;  %v3768_v37 = vld [vmem:[#allocation2 + $0x110] sm:$0xff]  ;;  %v3781_v27 = vld [vmem:[#allocation2 + $0x118] sm:$0x3] }
 0x45f   :  { %v931_v25 = vpack.c.bf16 %v892_v38, %v889_v4  ;;  %v901_v26 = vsel %vm862_vm5, %v899_v15, %v900_v16  ;;  %v3760_v55 = vld [vmem:[#allocation2 + $0xf0] sm:$0xff]  ;;  %v3762_v28 = vld [vmem:[#allocation2 + $0xf8] sm:$0x3]  ;;  %v1213_v16 = vrot.slane %v3632_v59, 2 }
 0x460   :  { %v895_v3 = vsel %vm862_vm5, %v893_v19, %v894_v23  ;;  %v902_v11 = vrot.slane %v3760_v55, 1  ;;  %v903_v33 = vrot.slane %v3762_v28, 1  ;;  %v3770_v41 = vld [vmem:[#allocation2 + $0x120] sm:$0xff]  ;;  %v3772_v35 = vld [vmem:[#allocation2 + $0x128] sm:$0x3]  ;;  %v1612_v54 = vpack.c.bf16 %v901_v26, %v898_v6 }
 0x461   :  { %2752 = vmatprep.mubr.msk.bf16.mxu0 %vm32_vm0, %v931_v25  ;;  %v3775_v51 = vpack.c.bf16 %v898_v6, %v895_v3  ;;  %v1611_v52 = vpack.c.bf16 %v895_v3, %v892_v38  ;;  %v3777_v18 = vld [vmem:[#allocation2 + $0x100] sm:$0xff]  ;;  %v3779_v53 = vld [vmem:[#allocation2 + $0x108] sm:$0x3]  ;;  %v1602_v0 = vrot.slane %v3770_v41, 1  ;;  %v1603_v15 = vrot.slane %v3772_v35, 1 }
 0x462   :  { %v904_v17 = vsel %vm862_vm5, %v902_v11, %v903_v33  ;;  %v905_v4 = vrot.slane %v3777_v18, 1  ;;  %v906_v39 = vrot.slane %v3779_v53, 1  ;;  %v908_v19 = vrot.slane %v3768_v37, 1 }
 0x463   :  { %2753 = vmatmul.mubr.msk.bf16.gmra.mrb[32].mxu0 %vm32_vm0, %v3775_v51  ;;  %2832 = vmatprep.mubr.msk.bf16.mxu1 %vm32_vm0, %v1611_v52  ;;  %v3789_v63 = vpack.c.bf16 %v904_v17, %v901_v26  ;;  %v909_v23 = vrot.slane %v3781_v27, 1  ;;  %v1214_v25 = vrot.slane %v3634_v60, 2  ;;  %v1210_v3 = vrot.slane %v3617_v49, 2 }
 0x464   :  { %2833 = vmatmul.mubr.msk.bf16.gmra.mrb[20].mxu1 %vm32_vm0, %v1612_v54  ;;  %v907_v38 = vsel %vm862_vm5, %v905_v4, %v906_v39  ;;  %v1211_v6 = vrot.slane %v3619_v62, 2  ;;  %v3805_v11 = vsel %vm862_vm5, %v1602_v0, %v1603_v15  ;;  %v818_v54 = vpack.c.bf16 %v3617_v49, %v3605_v34 }
 0x465   :  { %2756 = vmatprep.mubr.msk.bf16.mxu0 %vm32_vm0, %v3789_v63  ;;  %v1613_v26 = vpack.c.bf16 %v907_v38, %v904_v17  ;;  %v910_v33 = vsel %vm862_vm5, %v908_v19, %v909_v23  ;;  %v3809_v52 = vsel %vm1206_vm6, %v1213_v16, %v1214_v25  ;;  %v1219_v4 = vrot.slane %v3627_v40, 2 }
 0x466   :  { %v3811_v60 = vpack.c.bf16 %v910_v33, %v907_v38  ;;  %v1614_v17 = vpack.c.bf16 %v3805_v11, %v910_v33  ;;  %v3817_v62 = vsel %vm1206_vm6, %v1210_v3, %v1211_v6  ;;  %v1220_v39 = vrot.slane %v3629_v44, 2 }
 0x467   :  { %2836 = vmatprep.mubr.msk.bf16.mxu1 %vm32_vm0, %v1613_v26  ;;  %v1777_v0 = vpack.c.bf16 %v3809_v52, %v3817_v62  ;;  %v1216_v15 = vrot.slane %v3612_v42, 2  ;;  %v1225_v16 = vrot.slane %v3678_v24, 2  ;;  %v1226_v38 = vrot.slane %v3680_v58, 2 }
 0x468   :  { %v1217_v19 = vrot.slane %v3614_v46, 2  ;;  %v1222_v23 = vrot.slane %v3663_v61, 2  ;;  %v1223_v26 = vrot.slane %v3665_v43, 2  ;;  %v3845_v6 = vsel %vm1206_vm6, %v1219_v4, %v1220_v39  ;;  %v3071_v39 = vld [vmem:[%s4231_s6 + $0x68] sm:$0xff]  }
 0x469   :  { %v3848_v33 = vsel %vm1206_vm6, %v1225_v16, %v1226_v38  ;;  %v3855_v43 = vpack.c.bf16 %v3612_v42, %v3632_v59  ;;  %v1769_v16 = vrot.slane %v3672_v20, 2  ;;  %v1770_v38 = vrot.slane %v3674_v22, 2 }
 0x46a   :  { %v3864_v4 = vsel %vm1206_vm6, %v1222_v23, %v1223_v26  ;;  %v1237_v23 = vrot.slane %v3750_v12, 2  ;;  %v1238_v26 = vrot.slane %v3752_v13, 2  ;;  %v1228_v46 = vrot.slane %v3653_v10, 2 }
 0x46b   :  { %2757 = vmatmul.mubr.msk.bf16.gmra.mrb[36].mxu0 %vm32_vm0, %v3811_v60  ;;  %v1229_v58 = vrot.slane %v3655_v56, 2  ;;  %v1234_v22 = vrot.slane %v3737_v50, 2  ;;  %v1235_v3 = vrot.slane %v3739_v45, 2  ;;  %v3896_v13 = vsel %vm1206_vm6, %v1769_v16, %v1770_v38  ;;  %v3073_v56 = vld [vmem:[%s4231_s6 + $0x30] sm:$0xff]  }
 0x46c   :  { %2764 = vmatprep.mubr.msk.bf16.mxu0 %vm32_vm0, %v818_v54  ;;  %2837 = vmatmul.mubr.msk.bf16.gmra.mrb[24].mxu1 %vm32_vm0, %v1614_v17  ;;  %v3851_v54 = vsel %vm1206_vm6, %v1216_v15, %v1217_v19  ;;  %v1779_v15 = vpack.c.bf16 %v3848_v33, %v3864_v4  ;;  %v3070_v19 = vld [vmem:[%s4231_s6 + $0x28] sm:$0xff]   ;;  %v1247_v25 = vrot.slane %v3762_v28, 2  ;;  %v4234_v49 = vpack.c.bf16 %v3678_v24, %v3663_v61 }
 0x46d   :  { %2844 = vmatprep.mubr.msk.bf16.mxu1 %vm32_vm0, %v1777_v0  ;;  %v1778_v17 = vpack.c.bf16 %v3845_v6, %v3851_v54  ;;  %v3861_v0 = vpack.c.bf16 %v3663_v61, %v3627_v40  ;;  %v3907_v45 = vsel %vm1206_vm6, %v1228_v46, %v1229_v58  ;;  %v3914_v38 = vsel %vm1206_vm6, %v1234_v22, %v1235_v3 }
 0x46e   :  { %v1780_v16 = vpack.c.bf16 %v3896_v13, %v3907_v45  ;;  %v1243_v58 = vrot.slane %v3746_v7, 2  ;;  %v1244_v46 = vrot.slane %v3748_v8, 2  ;;  %v1249_v3 = vrot.slane %v3777_v18, 2 }
 0x46f   :  { %v1246_v22 = vrot.slane %v3760_v55, 2  ;;  %v4235_v40 = vpack.c.bf16 %v3672_v20, %v3653_v10 }
 0x470   :  { %v1245_v8 = vsel %vm1206_vm6, %v1243_v58, %v1244_v46  ;;  %v1208_v58 = vrot.slane %v3607_v36, 2  ;;  %v1772_v46 = vrot.slane %v3770_v41, 2  ;;  %v825_v36 = vpack.c.bf16 %v3768_v37, %v3777_v18 }
 0x471   :  { %v1248_v21 = vsel %vm1206_vm6, %v1246_v22, %v1247_v25  ;;  %v1253_v25 = vrot.slane %v3781_v27, 2  ;;  %v3965_v27 = vpack.c.bf16 %v3851_v54, %v3809_v52  ;;  %v3074_v52 = vld [vmem:[%s4231_s6 + $0x38] sm:$0xff]   ;;  %v1274_v54 = vpack.c.bf16 %v3907_v45, %v3848_v33  ;;  %v816_v33 = vld [vmem:[#allocation2 + $0x130] sm:$0xff] }
 0x472   :  { %v2084_v61 = vrot.slane %v816_v33, 1 }
 0x473   :  { %2765 = vmatmul.mubr.msk.bf16.vlgmr.msra.gmra.mrb[24].mxu0 %vm32_vm0, %v3855_v43 }
 0x474   :  { %2768 = vmatprep.mubr.msk.bf16.mxu0 %vm32_vm0, %v3861_v0  ;;  %2845 = vmatmul.mubr.msk.bf16.vlgmr.msra.gmra.mrb[12].mxu1 %vm32_vm0, %v1778_v17  ;;  %v3893_v17 = vld [vmem:[%s4231_s6 + $0x70] sm:$0xff]  }
 0x475   :  { %2848 = vmatprep.mubr.msk.bf16.mxu1 %vm32_vm0, %v1779_v15  ;;  %2861 = vmatpush3.bf16.msra.mxu1 %v3692_v9  ;;  %v3902_v9 = vsel %vm1206_vm6, %v1237_v23, %v1238_v26  ;;  %v822_v15 = vpack.c.bf16 %v3737_v50, %v3705_v31  ;;  %v1241_v26 = vrot.slane %v3731_v47, 2  ;;  %v1207_v47 = vrot.slane %v3605_v34, 2 }
 0x476   :  { %2781 = vmatpush3.bf16.msra.mxu0 %v3697_v14  ;;  %2862 = vmatprep.subr.bf16.mxu1 %v3071_v39  ;;  %v821_v14 = vpack.c.bf16 %v3653_v10, %v3678_v24  ;;  %v1781_v23 = vpack.c.bf16 %v3902_v9, %v3914_v38  ;;  %v4237_v24 = vpack.c.bf16 %v3746_v7, %v3729_v57 }
 0x477   :  { %2782 = vmatprep.subr.bf16.mxu0 %v3070_v19  ;;  %v1209_v34 = vsel %vm1206_vm6, %v1207_v47, %v1208_v58  ;;  %v1231_v47 = vrot.slane %v3705_v31, 2  ;;  %v3076_v31 = vld [vmem:[%s4231_s6 + $0x80] sm:$0xff]  }
 0x479   :  { %2863 = vmatpush3.bf16.msra.mxu1 %v3071_v39  ;;  %v1250_v39 = vrot.slane %v3779_v53, 2  ;;  %v824_v53 = vpack.c.bf16 %v3760_v55, %v3746_v7 }
 0x47a   :  { %2783 = vmatpush3.bf16.msra.mxu0 %v3070_v19  ;;  %2880 = vmatprep.subr.bf16.mxu1 %v3893_v17  ;;  %v1240_v19 = vrot.slane %v3729_v57, 2 }
 0x47b   :  { %2769 = vmatmul.mubr.msk.bf16.gmra.mrb[28].mxu0 %vm32_vm0, %v821_v14  ;;  %2800 = vmatprep.subr.bf16.mxu0 %v3073_v56 }
 0x47c   :  { %2772 = vmatprep.mubr.msk.bf16.mxu0 %vm32_vm0, %v822_v15  ;;  %2849 = vmatmul.mubr.msk.bf16.gmra.mrb[16].mxu1 %vm32_vm0, %v1780_v16  ;;  %v1251_v15 = vsel %vm1206_vm6, %v1249_v3, %v1250_v39  ;;  %v823_v16 = vpack.c.bf16 %v3729_v57, %v3750_v12  ;;  %v1242_v44 = vsel %vm1206_vm6, %v1240_v19, %v1241_v26  ;;  %v1773_v3 = vrot.slane %v3772_v35, 2 }
 0x47d   :  { %2852 = vmatprep.mubr.msk.bf16.mxu1 %vm32_vm0, %v1781_v23  ;;  %v1782_v23 = vpack.c.bf16 %v1245_v8, %v1242_v44  ;;  %v1783_v28 = vpack.c.bf16 %v1251_v15, %v1248_v21  ;;  %v1252_v39 = vrot.slane %v3768_v37, 2  ;;  %v1271_v26 = vpack.c.bf16 %v3817_v62, %v1209_v34  ;;  %v3075_v62 = vld [vmem:[%s4231_s6 + $0x78] sm:$0xff]  }
 0x47e   :  { %v3951_v19 = vsel %vm1206_vm6, %v1772_v46, %v1773_v3 }
 0x47f   :  { %v1254_v35 = vsel %vm1206_vm6, %v1252_v39, %v1253_v25 }
 0x480   :  { %v1784_v22 = vpack.c.bf16 %v3951_v19, %v1254_v35 }
 0x483   :  { %2773 = vmatmul.mubr.msk.bf16.gmra.mrb[32].mxu0 %vm32_vm0, %v823_v16 }
 0x484   :  { %2776 = vmatprep.mubr.msk.bf16.mxu0 %vm32_vm0, %v824_v53  ;;  %2853 = vmatmul.mubr.msk.bf16.gmra.mrb[20].mxu1 %vm32_vm0, %v1782_v23  ;;  %v3969_v23 = vpack.c.bf16 %v3864_v4, %v3845_v6  ;;  %v796_v6 = vld [vmem:[#allocation2 + $0x90] sm:$0xff]  ;;  %v1276_v4 = vpack.c.bf16 %v1242_v44, %v3902_v9  ;;  %v3077_v44 = vld [vmem:[%s4231_s6 + $0x88] sm:$0xff]  }
 0x485   :  { %2856 = vmatprep.mubr.msk.bf16.mxu1 %vm32_vm0, %v1783_v28  ;;  %v1232_v28 = vrot.slane %v3707_v32, 2  ;;  %v2081_v9 = vrot.slane %v796_v6, 1  ;;  %v2227_v57 = vrot.slane %v796_v6, 2 }
 0x487   :  { %v1233_v32 = vsel %vm1206_vm6, %v1231_v47, %v1232_v28 }
 0x48b   :  { %2777 = vmatmul.mubr.msk.bf16.gmra.mrb[36].mxu0 %vm32_vm0, %v825_v36 }
 0x48c   :  { %2784 = vmatprep.mubr.msk.bf16.mxu0 %vm32_vm0, %v1271_v26  ;;  %2857 = vmatmul.mubr.msk.bf16.gmra.mrb[24].mxu1 %vm32_vm0, %v1784_v22 }
 0x48d   :  { %2864 = vmatprep.mubr.msk.bf16.mxu1 %vm32_vm0, %v3855_v43  ;;  %v1275_v43 = vpack.c.bf16 %v3914_v38, %v1233_v32 }
 0x493   :  { %2785 = vmatmul.mubr.msk.bf16.vlgmr.msra.gmra.mrb[24].mxu0 %vm32_vm0, %v3965_v27 }
 0x494   :  { %2788 = vmatprep.mubr.msk.bf16.mxu0 %vm32_vm0, %v3969_v23  ;;  %2865 = vmatmul.mubr.msk.bf16.vlgmr.msra.gmra.mrb[12].mxu1 %vm32_vm0, %v3861_v0  ;;  %v1939_v0 = vpack.c.bf16 %v796_v6, %v3672_v20  ;;  %v4238_v20 = vpack.c.bf16 %v3777_v18, %v3760_v55  ;;  %v3159_v6 = vld [vmem:[%s4227_s0] sm:$0xff] }
 0x495   :  { %2868 = vmatprep.mubr.msk.bf16.mxu1 %vm32_vm0, %v821_v14  ;;  %2881 = vmatpush3.bf16.msra.mxu1 %v3893_v17  ;;  %v1277_v17 = vpack.c.bf16 %v1248_v21, %v1245_v8  ;;  %v1940_v14 = vpack.c.bf16 %v816_v33, %v3770_v41  ;;  %v797_v21 = vld [vmem:[#allocation2 + $0x98] sm:$0x3] }
 0x496   :  { %2801 = vmatpush3.bf16.msra.mxu0 %v3073_v56  ;;  %2882 = vmatprep.subr.bf16.mxu1 %v3075_v62  ;;  %v1278_v56 = vpack.c.bf16 %v1254_v35, %v1251_v15  ;;  %v2082_v45 = vrot.slane %v797_v21, 1 }
 0x497   :  { %2802 = vmatprep.subr.bf16.mxu0 %v3074_v52 }
 0x498   :  { %v2083_v59 = vsel %vm862_vm5, %v2081_v9, %v2082_v45 }
 0x499   :  { %2883 = vmatpush3.bf16.msra.mxu1 %v3075_v62  ;;  %v2089_v42 = vpack.c.bf16 %v2083_v59, %v3703_v30 }
 0x49a   :  { %2803 = vmatpush3.bf16.msra.mxu0 %v3074_v52  ;;  %2900 = vmatprep.subr.bf16.mxu1 %v3076_v31  ;;  %v3158_v52 = vld [vmem:[%s4227_s0 + $0x10] sm:$0xff] }
 0x49b   :  { %2789 = vmatmul.mubr.msk.bf16.gmra.mrb[28].mxu0 %vm32_vm0, %v1274_v54 }
 0x49c   :  { %2792 = vmatprep.mubr.msk.bf16.mxu0 %vm32_vm0, %v1275_v43  ;;  %2869 = vmatmul.mubr.msk.bf16.gmra.mrb[16].mxu1 %vm32_vm0, %v1939_v0  ;;  %v3160_v0 = vld [vmem:[%s4227_s0 + $0x18] sm:$0xff] }
 0x49d   :  { %2872 = vmatprep.mubr.msk.bf16.mxu1 %vm32_vm0, %v823_v16 }
 0x4a3   :  { %2793 = vmatmul.mubr.msk.bf16.gmra.mrb[32].mxu0 %vm32_vm0, %v1276_v4 }
 0x4a4   :  { %2796 = vmatprep.mubr.msk.bf16.mxu0 %vm32_vm0, %v1277_v17  ;;  %2873 = vmatmul.mubr.msk.bf16.gmra.mrb[20].mxu1 %vm32_vm0, %v824_v53 }
 0x4a5   :  { %2876 = vmatprep.mubr.msk.bf16.mxu1 %vm32_vm0, %v825_v36 }
 0x4ab   :  { %2797 = vmatmul.mubr.msk.bf16.gmra.mrb[36].mxu0 %vm32_vm0, %v1278_v56 }
 0x4ac   :  { %2804 = vmatprep.mubr.msk.bf16.mxu0 %vm32_vm0, %v1433_v1  ;;  %2877 = vmatmul.mubr.msk.bf16.gmra.mrb[24].mxu1 %vm32_vm0, %v1940_v14  ;;  %v2228_v1 = vrot.slane %v797_v21, 2 }
 0x4ad   :  { %2884 = vmatprep.mubr.msk.bf16.mxu1 %vm32_vm0, %v3648_v5  ;;  %v817_v5 = vld [vmem:[#allocation2 + $0x138] sm:$0x3] }
 0x4ae   :  { %v2085_v10 = vrot.slane %v817_v5, 1  ;;  %v2231_v55 = vrot.slane %v817_v5, 2 }
 0x4b3   :  { %2805 = vmatmul.mubr.msk.bf16.vlgmr.msra.gmra.mrb[24].mxu0 %vm32_vm0, %v1434_v2  ;;  %v4236_v2 = vpack.c.bf16 %v3750_v12, %v3737_v50  ;;  %v2229_v50 = vsel %vm1206_vm6, %v2227_v57, %v2228_v1  ;;  %v2230_v12 = vrot.slane %v816_v33, 2 }
 0x4b4   :  { %2808 = vmatprep.mubr.msk.bf16.mxu0 %vm32_vm0, %v4234_v49  ;;  %2885 = vmatmul.mubr.msk.bf16.vlgmr.msra.gmra.mrb[12].mxu1 %vm32_vm0, %v3700_v29  ;;  %v2086_v29 = vsel %vm862_vm5, %v2084_v61, %v2085_v10  ;;  %v2235_v7 = vpack.c.bf16 %v2229_v50, %v3896_v13 }
 0x4b5   :  { %2888 = vmatprep.mubr.msk.bf16.mxu1 %vm32_vm0, %v3715_v48  ;;  %2901 = vmatpush3.bf16.msra.mxu1 %v3076_v31  ;;  %v2090_v30 = vpack.c.bf16 %v2086_v29, %v3805_v11  ;;  %v4239_v48 = vpack.c.bf16 %v3770_v41, %v3768_v37  ;;  %v2232_v37 = vsel %vm1206_vm6, %v2230_v12, %v2231_v55  ;;  %v3164_v29 = vld [vmem:[%s4227_s0 + $0x38] sm:$0xff] }
 0x4b6   :  { %2902 = vmatprep.subr.bf16.mxu1 %v3077_v44  ;;  %v2236_v41 = vpack.c.bf16 %v2232_v37, %v3951_v19  ;;  %v4089_v19 = vld [vmem:[%s4232_s7] ss:$0 sm:$0xff] }
 0x4b9   :  { %2903 = vmatpush3.bf16.msra.mxu1 %v3077_v44 }
 0x4bb   :  { %2809 = vmatmul.mubr.msk.bf16.gmra.mrb[28].mxu0 %vm32_vm0, %v4235_v40 }
 0x4bc   :  { %2812 = vmatprep.mubr.msk.bf16.mxu0 %vm32_vm0, %v4236_v2  ;;  %2889 = vmatmul.mubr.msk.bf16.gmra.mrb[16].mxu1 %vm32_vm0, %v2089_v42  ;;  %v3162_v2 = vld [vmem:[%s4227_s0 + $0x30] sm:$0xff] }
 0x4bd   :  { %2892 = vmatprep.mubr.msk.bf16.mxu1 %vm32_vm0, %v3775_v51 }
 0x4c3   :  { %2813 = vmatmul.mubr.msk.bf16.gmra.mrb[32].mxu0 %vm32_vm0, %v4237_v24  ;;  %v3163_v24 = vld [vmem:[%s4227_s0 + $0x20] sm:$0xff] }
 0x4c4   :  { %2816 = vmatprep.mubr.msk.bf16.mxu0 %vm32_vm0, %v4238_v20  ;;  %2893 = vmatmul.mubr.msk.bf16.gmra.mrb[20].mxu1 %vm32_vm0, %v3789_v63 }
 0x4c5   :  { %2896 = vmatprep.mubr.msk.bf16.mxu1 %vm32_vm0, %v3811_v60 }
 0x4cb   :  { %2817 = vmatmul.mubr.msk.bf16.gmra.mrb[36].mxu0 %vm32_vm0, %v4239_v48  ;;  %v3165_v48 = vld [vmem:[%s4227_s0 + $0x28] sm:$0xff] }
 0x4cc   :  { %2897 = vmatmul.mubr.msk.bf16.gmra.mrb[24].mxu1 %vm32_vm0, %v2090_v30 }
 0x4cd   :  { %2904 = vmatprep.mubr.msk.bf16.mxu1 %vm32_vm0, %v3965_v27 }
 0x4d4   :  { %2905 = vmatmul.mubr.msk.bf16.vlgmr.msra.gmra.mrb[12].mxu1 %vm32_vm0, %v3969_v23 }
 0x4d5   :  { %2908 = vmatprep.mubr.msk.bf16.mxu1 %vm32_vm0, %v1274_v54 }
 0x4dc   :  { %2909 = vmatmul.mubr.msk.bf16.gmra.mrb[16].mxu1 %vm32_vm0, %v2235_v7 }
 0x4dd   :  { %2912 = vmatprep.mubr.msk.bf16.mxu1 %vm32_vm0, %v1276_v4 }
 0x4e4   :  { %2913 = vmatmul.mubr.msk.bf16.gmra.mrb[20].mxu1 %vm32_vm0, %v1277_v17  ;;  %v3161_v17 = vld [vmem:[%s4227_s0 + $0x8] sm:$0xff] }
 0x4e5   :  { %2916 = vmatprep.mubr.msk.bf16.mxu1 %vm32_vm0, %v1278_v56 }
 0x4ec   :  { %2917 = vmatmul.mubr.msk.bf16.gmra.mrb[24].mxu1 %vm32_vm0, %v2236_v41 }
 0x586   :  { %v2806_v51 = vpop.f32.mrb[24].mxu0 }
 0x587   :  { %v1516_v18 = vpop.f32.mrb[25].mxu0 }
 0x588   :  { %v2807_v63 = vpop.f32.mrb[26].mxu0 }
 0x589   :  { %v1519_v11 = vpop.f32.mrb[27].mxu0 }
 0x58e   :  { %v2810_v60 = vpop.f32.mrb[28].mxu0 }
 0x58f   :  { %v1532_v13 = vpop.f32.mrb[29].mxu0 }
 0x590   :  { %v2811_v38 = vpop.f32.mrb[30].mxu0 }
 0x591   :  { %v1535_v8 = vpop.f32.mrb[31].mxu0 }
 0x596   :  { %v2814_v15 = vpop.f32.mrb[32].mxu0 }
 0x597   :  { %v1548_v16 = vpop.f32.mrb[33].mxu0 }
 0x598   :  { %v4074_v53 = vpop.f32.mrb[34].mxu0 }
 0x599   :  { %v4076_v58 = vpop.f32.mrb[35].mxu0 }
 0x59e   :  { %v4078_v46 = vpop.f32.mrb[36].mxu0 }
 0x59f   :  { %v4080_v3 = vpop.f32.mrb[37].mxu0 }
 0x5a0   :  { %v4082_v39 = vpop.f32.mrb[38].mxu0 }
 0x5a1   :  { %v4084_v25 = vpop.f32.mrb[39].mxu0 }
 0x5a7   :  { %v2906_v34 = vpop.f32.mrb[12].mxu1 }
 0x5a8   :  { %v2922_v36 = vadd.f32 %v2906_v34, %v2806_v51  ;;  %v2294_v35 = vpop.f32.mrb[13].mxu1 }
 0x5a9   :  { %v2923_v26 = vadd.f32 %v2294_v35, %v1516_v18  ;;  %v2907_v22 = vpop.f32.mrb[14].mxu1 }
 0x5aa   :  { %v2382_v27 = vadd.f32 %v2922_v36, %v4089_v19  ;;  %v2924_v23 = vadd.f32 %v2907_v22, %v2807_v63  ;;  %v2297_v62 = vpop.f32.mrb[15].mxu1 }
 0x5ab   :  { %v2380_v47 = vadd.f32 %v2923_v26, %v4089_v19  ;;  %v2925_v28 = vadd.f32 %v2297_v62, %v1519_v11  ;;  %v3166_v11 = vld [vmem:[%s4227_s0 + $0x50] sm:$0xff] }
 0x5ac   :  { %v2398_v31 = vadd.f32 %v3158_v52, %v2382_v27  ;;  %v2383_v32 = vadd.f32 %v2924_v23, %v4089_v19 }
 0x5ad   :  { %v2396_v54 = vadd.f32 %v3159_v6, %v2380_v47  ;;  %v2381_v43 = vadd.f32 %v2925_v28, %v4089_v19 }
 0x5ae   :  { %2414 = vst.msk [vmem:[%s4233_s8 + $0x10] sm:$0xff] %vm32_vm0, %v2398_v31  ;;  %v2399_v4 = vadd.f32 %v3160_v0, %v2383_v32 }
 0x5af   :  { %2412 = vst.msk [vmem:[%s4233_s8] sm:$0xff] %vm32_vm0, %v2396_v54  ;;  %v2397_v33 = vadd.f32 %v3161_v17, %v2381_v43  ;;  %v2910_v56 = vpop.f32.mrb[16].mxu1  ;;  %v3173_v43 = vld [vmem:[%s4227_s0 + $0x68] sm:$0xff] }
 0x5b0   :  { %2415 = vst.msk [vmem:[%s4233_s8 + $0x18] sm:$0xff] %vm32_vm0, %v2399_v4  ;;  %v2926_v14 = vadd.f32 %v2910_v56, %v2810_v60  ;;  %v2310_v21 = vpop.f32.mrb[17].mxu1 }
 0x5b1   :  { %2413 = vst.msk [vmem:[%s4233_s8 + $0x8] sm:$0xff] %vm32_vm0, %v2397_v33  ;;  %v2927_v44 = vadd.f32 %v2310_v21, %v1532_v13  ;;  %v2911_v9 = vpop.f32.mrb[18].mxu1 }
 0x5b2   :  { %v2386_v45 = vadd.f32 %v2926_v14, %v4089_v19  ;;  %v2928_v49 = vadd.f32 %v2911_v9, %v2811_v38  ;;  %v2313_v59 = vpop.f32.mrb[19].mxu1  ;;  %v3167_v38 = vld [vmem:[%s4227_s0 + $0x40] sm:$0xff] }
 0x5b3   :  { %v2384_v42 = vadd.f32 %v2927_v44, %v4089_v19  ;;  %v2929_v40 = vadd.f32 %v2313_v59, %v1535_v8 }
 0x5b4   :  { %v2402_v5 = vadd.f32 %v3162_v2, %v2386_v45  ;;  %v2387_v61 = vadd.f32 %v2928_v49, %v4089_v19 }
 0x5b5   :  { %v2400_v10 = vadd.f32 %v3163_v24, %v2384_v42  ;;  %v2385_v20 = vadd.f32 %v2929_v40, %v4089_v19 }
 0x5b6   :  { %2418 = vst.msk [vmem:[%s4233_s8 + $0x30] sm:$0xff] %vm32_vm0, %v2402_v5  ;;  %v2403_v30 = vadd.f32 %v3164_v29, %v2387_v61 }
 0x5b7   :  { %2416 = vst.msk [vmem:[%s4233_s8 + $0x20] sm:$0xff] %vm32_vm0, %v2400_v10  ;;  %v2401_v57 = vadd.f32 %v3165_v48, %v2385_v20  ;;  %v2914_v1 = vpop.f32.mrb[20].mxu1 }
 0x5b8   :  { %2419 = vst.msk [vmem:[%s4233_s8 + $0x38] sm:$0xff] %vm32_vm0, %v2403_v30  ;;  %v2930_v50 = vadd.f32 %v2914_v1, %v2814_v15  ;;  %v2326_v7 = vpop.f32.mrb[21].mxu1 }
 0x5b9   :  { %2417 = vst.msk [vmem:[%s4233_s8 + $0x28] sm:$0xff] %vm32_vm0, %v2401_v57  ;;  %v2931_v12 = vadd.f32 %v2326_v7, %v1548_v16  ;;  %v2915_v55 = vpop.f32.mrb[22].mxu1  ;;  %v3168_v16 = vld [vmem:[%s4227_s0 + $0x58] sm:$0xff] }
 0x5ba   :  { %v2390_v37 = vadd.f32 %v2930_v50, %v4089_v19  ;;  %v2932_v41 = vadd.f32 %v2915_v55, %v4074_v53  ;;  %v2329_v51 = vpop.f32.mrb[23].mxu1 }
 0x5bb   :  { %v2388_v18 = vadd.f32 %v2931_v12, %v4089_v19  ;;  %v2933_v63 = vadd.f32 %v2329_v51, %v4076_v58  ;;  %v3169_v58 = vld [vmem:[%s4227_s0 + $0x48] sm:$0xff] }
 0x5bc   :  { %v2406_v60 = vadd.f32 %v3166_v11, %v2390_v37  ;;  %v2391_v13 = vadd.f32 %v2932_v41, %v4089_v19 }
 0x5bd   :  { %v2404_v8 = vadd.f32 %v3167_v38, %v2388_v18  ;;  %v2389_v15 = vadd.f32 %v2933_v63, %v4089_v19 }
 0x5be   :  { %2422 = vst.msk [vmem:[%s4233_s8 + $0x50] sm:$0xff] %vm32_vm0, %v2406_v60  ;;  %v2407_v53 = vadd.f32 %v3168_v16, %v2391_v13 }
 0x5bf   :  { %2420 = vst.msk [vmem:[%s4233_s8 + $0x40] sm:$0xff] %vm32_vm0, %v2404_v8  ;;  %v2405_v34 = vadd.f32 %v3169_v58, %v2389_v15  ;;  %v2918_v36 = vpop.f32.mrb[24].mxu1 }
 0x5c0   :  { %2423 = vst.msk [vmem:[%s4233_s8 + $0x58] sm:$0xff] %vm32_vm0, %v2407_v53  ;;  %v2934_v35 = vadd.f32 %v2918_v36, %v4078_v46  ;;  %v2342_v26 = vpop.f32.mrb[25].mxu1  ;;  %v3170_v46 = vld [vmem:[%s4227_s0 + $0x70] sm:$0xff] }
 0x5c1   :  { %2421 = vst.msk [vmem:[%s4233_s8 + $0x48] sm:$0xff] %vm32_vm0, %v2405_v34  ;;  %v2935_v22 = vadd.f32 %v2342_v26, %v4080_v3  ;;  %v2919_v27 = vpop.f32.mrb[26].mxu1  ;;  %v3171_v3 = vld [vmem:[%s4227_s0 + $0x60] sm:$0xff] }
 0x5c2   :  { %v2394_v23 = vadd.f32 %v2934_v35, %v4089_v19  ;;  %v2936_v62 = vadd.f32 %v2919_v27, %v4082_v39  ;;  %v2345_v47 = vpop.f32.mrb[27].mxu1  ;;  %v3172_v39 = vld [vmem:[%s4227_s0 + $0x78] sm:$0xff] }
 0x5c3   :  { %v2392_v28 = vadd.f32 %v2935_v22, %v4089_v19  ;;  %v2937_v52 = vadd.f32 %v2345_v47, %v4084_v25 }
 0x5c4   :  { %v2410_v31 = vadd.f32 %v3170_v46, %v2394_v23  ;;  %v2395_v32 = vadd.f32 %v2936_v62, %v4089_v19 }
 0x5c5   :  { %v2408_v6 = vadd.f32 %v3171_v3, %v2392_v28  ;;  %v2393_v54 = vadd.f32 %v2937_v52, %v4089_v19 }
 0x5c6   :  { %2426 = vst.msk [vmem:[%s4233_s8 + $0x70] sm:$0xff] %vm32_vm0, %v2410_v31  ;;  %v2411_v25 = vadd.f32 %v3172_v39, %v2395_v32 }
 0x5c7   :  { %2424 = vst.msk [vmem:[%s4233_s8 + $0x60] sm:$0xff] %vm32_vm0, %v2408_v6  ;;  %v2409_v19 = vadd.f32 %v3173_v43, %v2393_v54 }
 0x5c8   :  { %2427 = vst.msk [vmem:[%s4233_s8 + $0x78] sm:$0xff] %vm32_vm0, %v2411_v25 }
 0x5c9   :  { %2425 = vst.msk [vmem:[%s4233_s8 + $0x68] sm:$0xff] %vm32_vm0, %v2409_v19 }

</bundles_post_ra>
